<compile_context>
chip_gen: v7x
topology: tpu7x:2x2x1
jax: 0.10.0
libtpu: 0.0.40
codegen_flags: <defaults>
</compile_context>

<pallas_src>
import math

import jax
import jax.numpy as jnp
from jax import lax
from jax.experimental import pallas as pl
from jax.experimental.pallas import tpu as pltpu


# --------------------------------------------------------------------------- #
# Kernel
# --------------------------------------------------------------------------- #
def make_tcn_kernel(B_TILE, C_in, C_out, L, K, pad):
    KC = K * C_in  # size of the main-conv im2col block; the residual adds C_in more

    def kernel(x_ref, sc_ref, sh_ref, scd_ref, shd_ref, wbig_ref, bbig_ref,
               o_ref, hpad_ref, hbig_ref):
        cdt = hpad_ref.dtype  # bfloat16 compute dtype for the matmul operands

        # ---- BN (eval) + ReLU, both branches, in f32 on the whole batch tile ----
        x = x_ref[...]                                           # (B, C_in, L) f32
        h = jnp.maximum(x * sc_ref[...] + sh_ref[...], 0.0)      # main branch
        hd = jnp.maximum(x * scd_ref[...] + shd_ref[...], 0.0)   # down branch
        # Dropout(0.5) is identity in eval mode.

        # ---- zero-padded activations for the temporal conv ----
        # Only the 2*pad boundary lanes need zeros; the middle L lanes are fully
        # overwritten every step. (Zeroed every step so megacore sharding of the
        # parallel grid axis cannot leave a core with uninitialized scratch.)
        if pad > 0:
            hpad_ref[:, :, :pad] = jnp.zeros((B_TILE, C_in, pad), cdt)
            hpad_ref[:, :, pad + L:] = jnp.zeros((B_TILE, C_in, pad), cdt)
        hpad_ref[:, :, pad:pad + L] = h.astype(cdt)

        # ---- im2col: K shifted views + the residual (1x1) block ----
        for k in range(K):
            hbig_ref[:, k * C_in:(k + 1) * C_in, :] = hpad_ref[:, :, k:k + L]
        hbig_ref[:, KC:, :] = hd.astype(cdt)

        # ---- one fused MXU matmul per batch element (covers both convs) ----
        wbig = wbig_ref[...]          # (C_out, (K+1)*C_in) bf16
        bbig = bbig_ref[...]          # (C_out, 1)          f32 (bias + bias_d)
        for b in range(B_TILE):
            y = jnp.dot(wbig, hbig_ref[b],
                        preferred_element_type=jnp.float32)      # (C_out, L) f32
            o_ref[b] = (y + bbig).astype(o_ref.dtype)

    return kernel


def _pick_b_tile(N, cap=8):
    """Largest divisor of N that is <= cap."""
    for b in range(min(N, cap), 0, -1):
        if N % b == 0:
            return b
    return 1


# --------------------------------------------------------------------------- #
# Wrapper
# --------------------------------------------------------------------------- #
def tcn_unit_forward(x_ncl, kp, b_tile_cap=8):
    """x_ncl: (N, C_in, L) float32 in PyTorch NCL layout (kept end-to-end)."""
    N, C_in, L = x_ncl.shape
    wbig = kp["wbig"]
    C_out = wbig.shape[0]
    K = kp["K"]
    pad = (K - 1) // 2

    B_TILE = _pick_b_tile(N, b_tile_cap)
    grid = (N // B_TILE,)
    kernel = make_tcn_kernel(B_TILE, C_in, C_out, L, K, pad)

    grid_spec = pltpu.PrefetchScalarGridSpec(
        num_scalar_prefetch=0,
        grid=grid,
        in_specs=[
            pl.BlockSpec((B_TILE, C_in, L), lambda n: (n, 0, 0)),        # x
            pl.BlockSpec((C_in, 1), lambda n: (0, 0)),                   # bn scale (main)
            pl.BlockSpec((C_in, 1), lambda n: (0, 0)),                   # bn shift (main)
            pl.BlockSpec((C_in, 1), lambda n: (0, 0)),                   # bn scale (down)
            pl.BlockSpec((C_in, 1), lambda n: (0, 0)),                   # bn shift (down)
            pl.BlockSpec((C_out, (K + 1) * C_in), lambda n: (0, 0)),     # fused conv weight
            pl.BlockSpec((C_out, 1), lambda n: (0, 0)),                  # fused conv bias
        ],
        out_specs=pl.BlockSpec((B_TILE, C_out, L), lambda n: (n, 0, 0)),
        scratch_shapes=[
            pltpu.VMEM((B_TILE, C_in, L + 2 * pad), jnp.bfloat16),       # padded act.
            pltpu.VMEM((B_TILE, (K + 1) * C_in, L), jnp.bfloat16),       # im2col buffer
        ],
    )

    return pl.pallas_call(
        kernel,
        out_shape=jax.ShapeDtypeStruct((N, C_out, L), x_ncl.dtype),
        grid_spec=grid_spec,
        compiler_params=pltpu.CompilerParams(
            dimension_semantics=("parallel",),
            vmem_limit_bytes=32 * 1024 * 1024,
        ),
    )(x_ncl, kp["scale"], kp["shift"], kp["scale_d"], kp["shift_d"],
      kp["wbig"], kp["bbig"])


# --------------------------------------------------------------------------- #
# Parameters (PyTorch-module-style) and kernel-ready preprocessing
# --------------------------------------------------------------------------- #
def init_module_params(key, C_in, C_out, K):
    """Synthetic parameters matching TCN_unit.__init__ shapes (eval mode).

    Main and down BatchNorms get DISTINCT non-trivial parameters so the
    separate residual-BN path in the kernel is actually exercised.
    """
    ks = jax.random.split(key, 12)

    # main BN (unit1_1.bn)
    gamma = 1.0 + 0.1 * jax.random.normal(ks[0], (C_in,), jnp.float32)
    beta = 0.1 * jax.random.normal(ks[1], (C_in,), jnp.float32)
    mean = 0.1 * jax.random.normal(ks[2], (C_in,), jnp.float32)
    var = 1.0 + 0.1 * jax.random.uniform(ks[3], (C_in,), jnp.float32)

    # down BN (down1.bn) — distinct parameters
    gamma_d = 1.0 + 0.1 * jax.random.normal(ks[4], (C_in,), jnp.float32)
    beta_d = 0.1 * jax.random.normal(ks[5], (C_in,), jnp.float32)
    mean_d = 0.1 * jax.random.normal(ks[6], (C_in,), jnp.float32)
    var_d = 1.0 + 0.1 * jax.random.uniform(ks[7], (C_in,), jnp.float32)

    # main conv: PyTorch weight (C_out, C_in, K); conv_init -> N(0, sqrt(2/(C_out*K)))
    std = math.sqrt(2.0 / (C_out * K))
    w_ocik = std * jax.random.normal(ks[8], (C_out, C_in, K), jnp.float32)
    bb = 1.0 / math.sqrt(C_in * K)
    bias = jax.random.uniform(ks[9], (C_out,), jnp.float32, -bb, bb)

    # down conv (1x1): conv_init -> N(0, sqrt(2/C_out))
    std_d = math.sqrt(2.0 / C_out)
    wd_oci = std_d * jax.random.normal(ks[10], (C_out, C_in, 1), jnp.float32)
    bbd = 1.0 / math.sqrt(C_in)
    bias_d = jax.random.uniform(ks[11], (C_out,), jnp.float32, -bbd, bbd)

    return dict(gamma=gamma, beta=beta, mean=mean, var=var,
                gamma_d=gamma_d, beta_d=beta_d, mean_d=mean_d, var_d=var_d,
                w_ocik=w_ocik, bias=bias, wd_oci=wd_oci, bias_d=bias_d)


def prepare_kernel_params(mp, eps=1e-5):
    """Fold BN into scale/shift, fuse both conv weights/biases, cast weights to bf16."""
    C_out, C_in, K = mp["w_ocik"].shape

    sc = mp["gamma"] / jnp.sqrt(mp["var"] + eps)
    sh = mp["beta"] - mp["mean"] * sc
    scd = mp["gamma_d"] / jnp.sqrt(mp["var_d"] + eps)
    shd = mp["beta_d"] - mp["mean_d"] * scd

    # fused weight: columns [k*C_in:(k+1)*C_in] = W_main[:, :, k]; last block = W_down
    w_main = jnp.transpose(mp["w_ocik"], (0, 2, 1)).reshape(C_out, K * C_in)
    wbig = jnp.concatenate([w_main, mp["wd_oci"][:, :, 0]], axis=1).astype(jnp.bfloat16)
    bbig = (mp["bias"] + mp["bias_d"]).astype(jnp.float32).reshape(C_out, 1)

    return dict(scale=sc.reshape(C_in, 1), shift=sh.reshape(C_in, 1),
                scale_d=scd.reshape(C_in, 1), shift_d=shd.reshape(C_in, 1),
                wbig=wbig, bbig=bbig, K=K)


# --------------------------------------------------------------------------- #
# Pure-JAX reference (XLA convs), mirrors the PyTorch module in eval mode
# --------------------------------------------------------------------------- #
def ref_forward(x_ncl, mp, eps=1e-5):
    C_out, C_in, K = mp["w_ocik"].shape
    pad = (K - 1) // 2

    sc = mp["gamma"] / jnp.sqrt(mp["var"] + eps)
    sh = mp["beta"] - mp["mean"] * sc
    h = jnp.maximum(x_ncl * sc[None, :, None] + sh[None, :, None], 0.0)
    y = lax.conv_general_dilated(h, mp["w_ocik"], (1,), [(pad, pad)],
                                 dimension_numbers=("NCH", "OIH", "NCH"))
    y = y + mp["bias"][None, :, None]

    scd = mp["gamma_d"] / jnp.sqrt(mp["var_d"] + eps)
    shd = mp["beta_d"] - mp["mean_d"] * scd
    hd = jnp.maximum(x_ncl * scd[None, :, None] + shd[None, :, None], 0.0)
    yd = lax.conv_general_dilated(hd, mp["wd_oci"], (1,), [(0, 0)],
                                  dimension_numbers=("NCH", "OIH", "NCH"))
    yd = yd + mp["bias_d"][None, :, None]
    return y + yd


# --------------------------------------------------------------------------- #
if __name__ == "__main__":
    N, C_in, C_out, L, K = 16, 4, 8, 16, 9   # grid = (2,) with B_TILE = 8

    key = jax.random.PRNGKey(0)
    kx, kparam = jax.random.split(key)
    x = jax.random.normal(kx, (N, C_in, L), jnp.float32)   # PyTorch NCL input

    mparams = init_module_params(kparam, C_in, C_out, K)
    kparams = prepare_kernel_params(mparams)

    out = jax.block_until_ready(tcn_unit_forward(x, kparams))
    ref = jax.block_until_ready(ref_forward(x, mparams))

    assert out.shape == (N, C_out, L)
    max_err = jnp.max(jnp.abs(out - ref))
    # Tolerance reflects bf16 matmul operands (f32 accumulation) vs. an f32 reference.
    assert jnp.allclose(out, ref, atol=5e-2, rtol=5e-2), f"max abs err {max_err}"

    print("KERNEL_OK")
</pallas_src>

<mosaic_0001>
module attributes {stable_mosaic.version = 11 : i64} {
  func.func @kernel(%arg0: i32, %arg1: memref<8x4x16xf32, #tpu.memory_space<vmem>>, %arg2: memref<4x1xf32, #tpu.memory_space<vmem>>, %arg3: memref<4x1xf32, #tpu.memory_space<vmem>>, %arg4: memref<4x1xf32, #tpu.memory_space<vmem>>, %arg5: memref<4x1xf32, #tpu.memory_space<vmem>>, %arg6: memref<8x40xbf16, #tpu.memory_space<vmem>>, %arg7: memref<8x1xf32, #tpu.memory_space<vmem>>, %arg8: memref<8x8x16xf32, #tpu.memory_space<vmem>>, %arg9: memref<8x4x24xbf16, #tpu.memory_space<vmem>>, %arg10: memref<8x40x16xbf16, #tpu.memory_space<vmem>>) attributes {dimension_semantics = [#tpu.dimension_semantics<parallel>], iteration_bounds = array<i64: 2>, scalar_prefetch = 0 : i64, scratch_operands = 2 : i64, tpu.core_type = #tpu.core_type<tc>, window_params = [{transform_indices = @transform_0, window_bounds = array<i64: 8, 4, 16>}, {pipeline_mode = #tpu.pipeline_mode<synchronous>, transform_indices = @transform_1, window_bounds = array<i64: 4, 1>}, {pipeline_mode = #tpu.pipeline_mode<synchronous>, transform_indices = @transform_2, window_bounds = array<i64: 4, 1>}, {pipeline_mode = #tpu.pipeline_mode<synchronous>, transform_indices = @transform_3, window_bounds = array<i64: 4, 1>}, {pipeline_mode = #tpu.pipeline_mode<synchronous>, transform_indices = @transform_4, window_bounds = array<i64: 4, 1>}, {pipeline_mode = #tpu.pipeline_mode<synchronous>, transform_indices = @transform_5, window_bounds = array<i64: 8, 40>}, {pipeline_mode = #tpu.pipeline_mode<synchronous>, transform_indices = @transform_6, window_bounds = array<i64: 8, 1>}, {transform_indices = @transform_7, window_bounds = array<i64: 8, 8, 16>}]} {
    %c0 = arith.constant 0 : index
    %c0_0 = arith.constant 0 : index
    %c0_1 = arith.constant 0 : index
    %0 = vector.load %arg1[%c0, %c0_0, %c0_1] : memref<8x4x16xf32, #tpu.memory_space<vmem>>, vector<8x4x16xf32>
    %c0_2 = arith.constant 0 : index
    %c0_3 = arith.constant 0 : index
    %1 = vector.load %arg2[%c0_2, %c0_3] : memref<4x1xf32, #tpu.memory_space<vmem>>, vector<4x1xf32>
    %2 = vector.shape_cast %1 : vector<4x1xf32> to vector<1x4x1xf32>
    %3 = vector.broadcast %2 : vector<1x4x1xf32> to vector<8x4x16xf32>
    %4 = arith.mulf %0, %3 : vector<8x4x16xf32>
    %c0_4 = arith.constant 0 : index
    %c0_5 = arith.constant 0 : index
    %5 = vector.load %arg3[%c0_4, %c0_5] : memref<4x1xf32, #tpu.memory_space<vmem>>, vector<4x1xf32>
    %6 = vector.shape_cast %5 : vector<4x1xf32> to vector<1x4x1xf32>
    %7 = vector.broadcast %6 : vector<1x4x1xf32> to vector<8x4x16xf32>
    %8 = arith.addf %4, %7 : vector<8x4x16xf32>
    %cst = arith.constant 0.000000e+00 : f32
    %9 = vector.broadcast %cst : f32 to vector<8x4x16xf32>
    %10 = arith.maximumf %8, %9 : vector<8x4x16xf32>
    %c0_6 = arith.constant 0 : index
    %c0_7 = arith.constant 0 : index
    %11 = vector.load %arg4[%c0_6, %c0_7] : memref<4x1xf32, #tpu.memory_space<vmem>>, vector<4x1xf32>
    %12 = vector.shape_cast %11 : vector<4x1xf32> to vector<1x4x1xf32>
    %13 = vector.broadcast %12 : vector<1x4x1xf32> to vector<8x4x16xf32>
    %14 = arith.mulf %0, %13 : vector<8x4x16xf32>
    %c0_8 = arith.constant 0 : index
    %c0_9 = arith.constant 0 : index
    %15 = vector.load %arg5[%c0_8, %c0_9] : memref<4x1xf32, #tpu.memory_space<vmem>>, vector<4x1xf32>
    %16 = vector.shape_cast %15 : vector<4x1xf32> to vector<1x4x1xf32>
    %17 = vector.broadcast %16 : vector<1x4x1xf32> to vector<8x4x16xf32>
    %18 = arith.addf %14, %17 : vector<8x4x16xf32>
    %cst_10 = arith.constant 0.000000e+00 : f32
    %19 = vector.broadcast %cst_10 : f32 to vector<8x4x16xf32>
    %20 = arith.maximumf %18, %19 : vector<8x4x16xf32>
    %cst_11 = arith.constant 0.000000e+00 : bf16
    %21 = vector.broadcast %cst_11 : bf16 to vector<8x4x4xbf16>
    %c0_12 = arith.constant 0 : index
    %c0_13 = arith.constant 0 : index
    %c0_14 = arith.constant 0 : index
    %22 = vector.load %arg9[%c0_12, %c0_13, %c0_14] : memref<8x4x24xbf16, #tpu.memory_space<vmem>>, vector<8x4x4xbf16>
    tpu.vector_store %arg9[%c0_12, %c0_13, %c0_14], %21 {strides = array<i32>} : memref<8x4x24xbf16, #tpu.memory_space<vmem>>, vector<8x4x4xbf16>,
    %cst_15 = arith.constant 0.000000e+00 : bf16
    %23 = vector.broadcast %cst_15 : bf16 to vector<8x4x4xbf16>
    %c0_16 = arith.constant 0 : index
    %c0_17 = arith.constant 0 : index
    %c20 = arith.constant 20 : index
    %24 = vector.load %arg9[%c0_16, %c0_17, %c20] : memref<8x4x24xbf16, #tpu.memory_space<vmem>>, vector<8x4x4xbf16>
    tpu.vector_store %arg9[%c0_16, %c0_17, %c20], %23 {strides = array<i32>} : memref<8x4x24xbf16, #tpu.memory_space<vmem>>, vector<8x4x4xbf16>,
    %25 = arith.truncf %10 : vector<8x4x16xf32> to vector<8x4x16xbf16>
    %c0_18 = arith.constant 0 : index
    %c0_19 = arith.constant 0 : index
    %c4 = arith.constant 4 : index
    %26 = vector.load %arg9[%c0_18, %c0_19, %c4] : memref<8x4x24xbf16, #tpu.memory_space<vmem>>, vector<8x4x16xbf16>
    tpu.vector_store %arg9[%c0_18, %c0_19, %c4], %25 {strides = array<i32>} : memref<8x4x24xbf16, #tpu.memory_space<vmem>>, vector<8x4x16xbf16>,
    %c0_20 = arith.constant 0 : index
    %c0_21 = arith.constant 0 : index
    %c0_22 = arith.constant 0 : index
    %27 = vector.load %arg9[%c0_20, %c0_21, %c0_22] : memref<8x4x24xbf16, #tpu.memory_space<vmem>>, vector<8x4x16xbf16>
    %c0_23 = arith.constant 0 : index
    %c0_24 = arith.constant 0 : index
    %c0_25 = arith.constant 0 : index
    %28 = vector.load %arg10[%c0_23, %c0_24, %c0_25] : memref<8x40x16xbf16, #tpu.memory_space<vmem>>, vector<8x4x16xbf16>
    tpu.vector_store %arg10[%c0_23, %c0_24, %c0_25], %27 {strides = array<i32>} : memref<8x40x16xbf16, #tpu.memory_space<vmem>>, vector<8x4x16xbf16>,
    %c0_26 = arith.constant 0 : index
    %c0_27 = arith.constant 0 : index
    %c1 = arith.constant 1 : index
    %29 = vector.load %arg9[%c0_26, %c0_27, %c1] : memref<8x4x24xbf16, #tpu.memory_space<vmem>>, vector<8x4x16xbf16>
    %c0_28 = arith.constant 0 : index
    %c4_29 = arith.constant 4 : index
    %c0_30 = arith.constant 0 : index
    %30 = vector.load %arg10[%c0_28, %c4_29, %c0_30] : memref<8x40x16xbf16, #tpu.memory_space<vmem>>, vector<8x4x16xbf16>
    tpu.vector_store %arg10[%c0_28, %c4_29, %c0_30], %29 {strides = array<i32>} : memref<8x40x16xbf16, #tpu.memory_space<vmem>>, vector<8x4x16xbf16>,
    %c0_31 = arith.constant 0 : index
    %c0_32 = arith.constant 0 : index
    %c2 = arith.constant 2 : index
    %31 = vector.load %arg9[%c0_31, %c0_32, %c2] : memref<8x4x24xbf16, #tpu.memory_space<vmem>>, vector<8x4x16xbf16>
    %c0_33 = arith.constant 0 : index
    %c8 = arith.constant 8 : index
    %c0_34 = arith.constant 0 : index
    %32 = vector.load %arg10[%c0_33, %c8, %c0_34] : memref<8x40x16xbf16, #tpu.memory_space<vmem>>, vector<8x4x16xbf16>
    tpu.vector_store %arg10[%c0_33, %c8, %c0_34], %31 {strides = array<i32>} : memref<8x40x16xbf16, #tpu.memory_space<vmem>>, vector<8x4x16xbf16>,
    %c0_35 = arith.constant 0 : index
    %c0_36 = arith.constant 0 : index
    %c3 = arith.constant 3 : index
    %33 = vector.load %arg9[%c0_35, %c0_36, %c3] : memref<8x4x24xbf16, #tpu.memory_space<vmem>>, vector<8x4x16xbf16>
    %c0_37 = arith.constant 0 : index
    %c12 = arith.constant 12 : index
    %c0_38 = arith.constant 0 : index
    %34 = vector.load %arg10[%c0_37, %c12, %c0_38] : memref<8x40x16xbf16, #tpu.memory_space<vmem>>, vector<8x4x16xbf16>
    tpu.vector_store %arg10[%c0_37, %c12, %c0_38], %33 {strides = array<i32>} : memref<8x40x16xbf16, #tpu.memory_space<vmem>>, vector<8x4x16xbf16>,
    %c0_39 = arith.constant 0 : index
    %c0_40 = arith.constant 0 : index
    %c4_41 = arith.constant 4 : index
    %35 = vector.load %arg9[%c0_39, %c0_40, %c4_41] : memref<8x4x24xbf16, #tpu.memory_space<vmem>>, vector<8x4x16xbf16>
    %c0_42 = arith.constant 0 : index
    %c16 = arith.constant 16 : index
    %c0_43 = arith.constant 0 : index
    %36 = vector.load %arg10[%c0_42, %c16, %c0_43] : memref<8x40x16xbf16, #tpu.memory_space<vmem>>, vector<8x4x16xbf16>
    tpu.vector_store %arg10[%c0_42, %c16, %c0_43], %35 {strides = array<i32>} : memref<8x40x16xbf16, #tpu.memory_space<vmem>>, vector<8x4x16xbf16>,
    %c0_44 = arith.constant 0 : index
    %c0_45 = arith.constant 0 : index
    %c5 = arith.constant 5 : index
    %37 = vector.load %arg9[%c0_44, %c0_45, %c5] : memref<8x4x24xbf16, #tpu.memory_space<vmem>>, vector<8x4x16xbf16>
    %c0_46 = arith.constant 0 : index
    %c20_47 = arith.constant 20 : index
    %c0_48 = arith.constant 0 : index
    %38 = vector.load %arg10[%c0_46, %c20_47, %c0_48] : memref<8x40x16xbf16, #tpu.memory_space<vmem>>, vector<8x4x16xbf16>
    tpu.vector_store %arg10[%c0_46, %c20_47, %c0_48], %37 {strides = array<i32>} : memref<8x40x16xbf16, #tpu.memory_space<vmem>>, vector<8x4x16xbf16>,
    %c0_49 = arith.constant 0 : index
    %c0_50 = arith.constant 0 : index
    %c6 = arith.constant 6 : index
    %39 = vector.load %arg9[%c0_49, %c0_50, %c6] : memref<8x4x24xbf16, #tpu.memory_space<vmem>>, vector<8x4x16xbf16>
    %c0_51 = arith.constant 0 : index
    %c24 = arith.constant 24 : index
    %c0_52 = arith.constant 0 : index
    %40 = vector.load %arg10[%c0_51, %c24, %c0_52] : memref<8x40x16xbf16, #tpu.memory_space<vmem>>, vector<8x4x16xbf16>
    tpu.vector_store %arg10[%c0_51, %c24, %c0_52], %39 {strides = array<i32>} : memref<8x40x16xbf16, #tpu.memory_space<vmem>>, vector<8x4x16xbf16>,
    %c0_53 = arith.constant 0 : index
    %c0_54 = arith.constant 0 : index
    %c7 = arith.constant 7 : index
    %41 = vector.load %arg9[%c0_53, %c0_54, %c7] : memref<8x4x24xbf16, #tpu.memory_space<vmem>>, vector<8x4x16xbf16>
    %c0_55 = arith.constant 0 : index
    %c28 = arith.constant 28 : index
    %c0_56 = arith.constant 0 : index
    %42 = vector.load %arg10[%c0_55, %c28, %c0_56] : memref<8x40x16xbf16, #tpu.memory_space<vmem>>, vector<8x4x16xbf16>
    tpu.vector_store %arg10[%c0_55, %c28, %c0_56], %41 {strides = array<i32>} : memref<8x40x16xbf16, #tpu.memory_space<vmem>>, vector<8x4x16xbf16>,
    %c0_57 = arith.constant 0 : index
    %c0_58 = arith.constant 0 : index
    %c8_59 = arith.constant 8 : index
    %43 = vector.load %arg9[%c0_57, %c0_58, %c8_59] : memref<8x4x24xbf16, #tpu.memory_space<vmem>>, vector<8x4x16xbf16>
    %c0_60 = arith.constant 0 : index
    %c32 = arith.constant 32 : index
    %c0_61 = arith.constant 0 : index
    %44 = vector.load %arg10[%c0_60, %c32, %c0_61] : memref<8x40x16xbf16, #tpu.memory_space<vmem>>, vector<8x4x16xbf16>
    tpu.vector_store %arg10[%c0_60, %c32, %c0_61], %43 {strides = array<i32>} : memref<8x40x16xbf16, #tpu.memory_space<vmem>>, vector<8x4x16xbf16>,
    %45 = arith.truncf %20 : vector<8x4x16xf32> to vector<8x4x16xbf16>
    %c0_62 = arith.constant 0 : index
    %c36 = arith.constant 36 : index
    %c0_63 = arith.constant 0 : index
    %46 = vector.load %arg10[%c0_62, %c36, %c0_63] : memref<8x40x16xbf16, #tpu.memory_space<vmem>>, vector<8x4x16xbf16>
    tpu.vector_store %arg10[%c0_62, %c36, %c0_63], %45 {strides = array<i32>} : memref<8x40x16xbf16, #tpu.memory_space<vmem>>, vector<8x4x16xbf16>,
    %c0_64 = arith.constant 0 : index
    %c0_65 = arith.constant 0 : index
    %47 = vector.load %arg6[%c0_64, %c0_65] : memref<8x40xbf16, #tpu.memory_space<vmem>>, vector<8x40xbf16>
    %c0_66 = arith.constant 0 : index
    %c0_67 = arith.constant 0 : index
    %48 = vector.load %arg7[%c0_66, %c0_67] : memref<8x1xf32, #tpu.memory_space<vmem>>, vector<8x1xf32>
    %c0_68 = arith.constant 0 : index
    %c0_69 = arith.constant 0 : index
    %c0_70 = arith.constant 0 : index
    %49 = vector.load %arg10[%c0_68, %c0_69, %c0_70] : memref<8x40x16xbf16, #tpu.memory_space<vmem>>, vector<1x40x16xbf16>
    %50 = vector.shape_cast %49 : vector<1x40x16xbf16> to vector<40x16xbf16>
    %cst_71 = arith.constant dense<0.000000e+00> : vector<8x16xf32>
    %51 = tpu.matmul %47, %50, %cst_71 {dimension_numbers = #tpu.dot_dimension_numbers<[1], [0], [0], [1], [0, 0, 1, 1], [], []>} : vector<8x40xbf16>, vector<40x16xbf16>, vector<8x16xf32> -> vector<8x16xf32>
    %52 = vector.broadcast %48 : vector<8x1xf32> to vector<8x16xf32>
    %53 = arith.addf %51, %52 : vector<8x16xf32>
    %c0_72 = arith.constant 0 : index
    %c0_73 = arith.constant 0 : index
    %c0_74 = arith.constant 0 : index
    %54 = vector.load %arg8[%c0_72, %c0_73, %c0_74] : memref<8x8x16xf32, #tpu.memory_space<vmem>>, vector<1x8x16xf32>
    %55 = vector.shape_cast %54 : vector<1x8x16xf32> to vector<8x16xf32>
    %56 = vector.shape_cast %53 : vector<8x16xf32> to vector<1x8x16xf32>
    tpu.vector_store %arg8[%c0_72, %c0_73, %c0_74], %56 {strides = array<i32>} : memref<8x8x16xf32, #tpu.memory_space<vmem>>, vector<1x8x16xf32>,
    %c1_75 = arith.constant 1 : index
    %c0_76 = arith.constant 0 : index
    %c0_77 = arith.constant 0 : index
    %57 = vector.load %arg10[%c1_75, %c0_76, %c0_77] : memref<8x40x16xbf16, #tpu.memory_space<vmem>>, vector<1x40x16xbf16>
    %58 = vector.shape_cast %57 : vector<1x40x16xbf16> to vector<40x16xbf16>
    %cst_78 = arith.constant dense<0.000000e+00> : vector<8x16xf32>
    %59 = tpu.matmul %47, %58, %cst_78 {dimension_numbers = #tpu.dot_dimension_numbers<[1], [0], [0], [1], [0, 0, 1, 1], [], []>} : vector<8x40xbf16>, vector<40x16xbf16>, vector<8x16xf32> -> vector<8x16xf32>
    %60 = vector.broadcast %48 : vector<8x1xf32> to vector<8x16xf32>
    %61 = arith.addf %59, %60 : vector<8x16xf32>
    %c1_79 = arith.constant 1 : index
    %c0_80 = arith.constant 0 : index
    %c0_81 = arith.constant 0 : index
    %62 = vector.load %arg8[%c1_79, %c0_80, %c0_81] : memref<8x8x16xf32, #tpu.memory_space<vmem>>, vector<1x8x16xf32>
    %63 = vector.shape_cast %62 : vector<1x8x16xf32> to vector<8x16xf32>
    %64 = vector.shape_cast %61 : vector<8x16xf32> to vector<1x8x16xf32>
    tpu.vector_store %arg8[%c1_79, %c0_80, %c0_81], %64 {strides = array<i32>} : memref<8x8x16xf32, #tpu.memory_space<vmem>>, vector<1x8x16xf32>,
    %c2_82 = arith.constant 2 : index
    %c0_83 = arith.constant 0 : index
    %c0_84 = arith.constant 0 : index
    %65 = vector.load %arg10[%c2_82, %c0_83, %c0_84] : memref<8x40x16xbf16, #tpu.memory_space<vmem>>, vector<1x40x16xbf16>
    %66 = vector.shape_cast %65 : vector<1x40x16xbf16> to vector<40x16xbf16>
    %cst_85 = arith.constant dense<0.000000e+00> : vector<8x16xf32>
    %67 = tpu.matmul %47, %66, %cst_85 {dimension_numbers = #tpu.dot_dimension_numbers<[1], [0], [0], [1], [0, 0, 1, 1], [], []>} : vector<8x40xbf16>, vector<40x16xbf16>, vector<8x16xf32> -> vector<8x16xf32>
    %68 = vector.broadcast %48 : vector<8x1xf32> to vector<8x16xf32>
    %69 = arith.addf %67, %68 : vector<8x16xf32>
    %c2_86 = arith.constant 2 : index
    %c0_87 = arith.constant 0 : index
    %c0_88 = arith.constant 0 : index
    %70 = vector.load %arg8[%c2_86, %c0_87, %c0_88] : memref<8x8x16xf32, #tpu.memory_space<vmem>>, vector<1x8x16xf32>
    %71 = vector.shape_cast %70 : vector<1x8x16xf32> to vector<8x16xf32>
    %72 = vector.shape_cast %69 : vector<8x16xf32> to vector<1x8x16xf32>
    tpu.vector_store %arg8[%c2_86, %c0_87, %c0_88], %72 {strides = array<i32>} : memref<8x8x16xf32, #tpu.memory_space<vmem>>, vector<1x8x16xf32>,
    %c3_89 = arith.constant 3 : index
    %c0_90 = arith.constant 0 : index
    %c0_91 = arith.constant 0 : index
    %73 = vector.load %arg10[%c3_89, %c0_90, %c0_91] : memref<8x40x16xbf16, #tpu.memory_space<vmem>>, vector<1x40x16xbf16>
    %74 = vector.shape_cast %73 : vector<1x40x16xbf16> to vector<40x16xbf16>
    %cst_92 = arith.constant dense<0.000000e+00> : vector<8x16xf32>
    %75 = tpu.matmul %47, %74, %cst_92 {dimension_numbers = #tpu.dot_dimension_numbers<[1], [0], [0], [1], [0, 0, 1, 1], [], []>} : vector<8x40xbf16>, vector<40x16xbf16>, vector<8x16xf32> -> vector<8x16xf32>
    %76 = vector.broadcast %48 : vector<8x1xf32> to vector<8x16xf32>
    %77 = arith.addf %75, %76 : vector<8x16xf32>
    %c3_93 = arith.constant 3 : index
    %c0_94 = arith.constant 0 : index
    %c0_95 = arith.constant 0 : index
    %78 = vector.load %arg8[%c3_93, %c0_94, %c0_95] : memref<8x8x16xf32, #tpu.memory_space<vmem>>, vector<1x8x16xf32>
    %79 = vector.shape_cast %78 : vector<1x8x16xf32> to vector<8x16xf32>
    %80 = vector.shape_cast %77 : vector<8x16xf32> to vector<1x8x16xf32>
    tpu.vector_store %arg8[%c3_93, %c0_94, %c0_95], %80 {strides = array<i32>} : memref<8x8x16xf32, #tpu.memory_space<vmem>>, vector<1x8x16xf32>,
    %c4_96 = arith.constant 4 : index
    %c0_97 = arith.constant 0 : index
    %c0_98 = arith.constant 0 : index
    %81 = vector.load %arg10[%c4_96, %c0_97, %c0_98] : memref<8x40x16xbf16, #tpu.memory_space<vmem>>, vector<1x40x16xbf16>
    %82 = vector.shape_cast %81 : vector<1x40x16xbf16> to vector<40x16xbf16>
    %cst_99 = arith.constant dense<0.000000e+00> : vector<8x16xf32>
    %83 = tpu.matmul %47, %82, %cst_99 {dimension_numbers = #tpu.dot_dimension_numbers<[1], [0], [0], [1], [0, 0, 1, 1], [], []>} : vector<8x40xbf16>, vector<40x16xbf16>, vector<8x16xf32> -> vector<8x16xf32>
    %84 = vector.broadcast %48 : vector<8x1xf32> to vector<8x16xf32>
    %85 = arith.addf %83, %84 : vector<8x16xf32>
    %c4_100 = arith.constant 4 : index
    %c0_101 = arith.constant 0 : index
    %c0_102 = arith.constant 0 : index
    %86 = vector.load %arg8[%c4_100, %c0_101, %c0_102] : memref<8x8x16xf32, #tpu.memory_space<vmem>>, vector<1x8x16xf32>
    %87 = vector.shape_cast %86 : vector<1x8x16xf32> to vector<8x16xf32>
    %88 = vector.shape_cast %85 : vector<8x16xf32> to vector<1x8x16xf32>
    tpu.vector_store %arg8[%c4_100, %c0_101, %c0_102], %88 {strides = array<i32>} : memref<8x8x16xf32, #tpu.memory_space<vmem>>, vector<1x8x16xf32>,
    %c5_103 = arith.constant 5 : index
    %c0_104 = arith.constant 0 : index
    %c0_105 = arith.constant 0 : index
    %89 = vector.load %arg10[%c5_103, %c0_104, %c0_105] : memref<8x40x16xbf16, #tpu.memory_space<vmem>>, vector<1x40x16xbf16>
    %90 = vector.shape_cast %89 : vector<1x40x16xbf16> to vector<40x16xbf16>
    %cst_106 = arith.constant dense<0.000000e+00> : vector<8x16xf32>
    %91 = tpu.matmul %47, %90, %cst_106 {dimension_numbers = #tpu.dot_dimension_numbers<[1], [0], [0], [1], [0, 0, 1, 1], [], []>} : vector<8x40xbf16>, vector<40x16xbf16>, vector<8x16xf32> -> vector<8x16xf32>
    %92 = vector.broadcast %48 : vector<8x1xf32> to vector<8x16xf32>
    %93 = arith.addf %91, %92 : vector<8x16xf32>
    %c5_107 = arith.constant 5 : index
    %c0_108 = arith.constant 0 : index
    %c0_109 = arith.constant 0 : index
    %94 = vector.load %arg8[%c5_107, %c0_108, %c0_109] : memref<8x8x16xf32, #tpu.memory_space<vmem>>, vector<1x8x16xf32>
    %95 = vector.shape_cast %94 : vector<1x8x16xf32> to vector<8x16xf32>
    %96 = vector.shape_cast %93 : vector<8x16xf32> to vector<1x8x16xf32>
    tpu.vector_store %arg8[%c5_107, %c0_108, %c0_109], %96 {strides = array<i32>} : memref<8x8x16xf32, #tpu.memory_space<vmem>>, vector<1x8x16xf32>,
    %c6_110 = arith.constant 6 : index
    %c0_111 = arith.constant 0 : index
    %c0_112 = arith.constant 0 : index
    %97 = vector.load %arg10[%c6_110, %c0_111, %c0_112] : memref<8x40x16xbf16, #tpu.memory_space<vmem>>, vector<1x40x16xbf16>
    %98 = vector.shape_cast %97 : vector<1x40x16xbf16> to vector<40x16xbf16>
    %cst_113 = arith.constant dense<0.000000e+00> : vector<8x16xf32>
    %99 = tpu.matmul %47, %98, %cst_113 {dimension_numbers = #tpu.dot_dimension_numbers<[1], [0], [0], [1], [0, 0, 1, 1], [], []>} : vector<8x40xbf16>, vector<40x16xbf16>, vector<8x16xf32> -> vector<8x16xf32>
    %100 = vector.broadcast %48 : vector<8x1xf32> to vector<8x16xf32>
    %101 = arith.addf %99, %100 : vector<8x16xf32>
    %c6_114 = arith.constant 6 : index
    %c0_115 = arith.constant 0 : index
    %c0_116 = arith.constant 0 : index
    %102 = vector.load %arg8[%c6_114, %c0_115, %c0_116] : memref<8x8x16xf32, #tpu.memory_space<vmem>>, vector<1x8x16xf32>
    %103 = vector.shape_cast %102 : vector<1x8x16xf32> to vector<8x16xf32>
    %104 = vector.shape_cast %101 : vector<8x16xf32> to vector<1x8x16xf32>
    tpu.vector_store %arg8[%c6_114, %c0_115, %c0_116], %104 {strides = array<i32>} : memref<8x8x16xf32, #tpu.memory_space<vmem>>, vector<1x8x16xf32>,
    %c7_117 = arith.constant 7 : index
    %c0_118 = arith.constant 0 : index
    %c0_119 = arith.constant 0 : index
    %105 = vector.load %arg10[%c7_117, %c0_118, %c0_119] : memref<8x40x16xbf16, #tpu.memory_space<vmem>>, vector<1x40x16xbf16>
    %106 = vector.shape_cast %105 : vector<1x40x16xbf16> to vector<40x16xbf16>
    %cst_120 = arith.constant dense<0.000000e+00> : vector<8x16xf32>
    %107 = tpu.matmul %47, %106, %cst_120 {dimension_numbers = #tpu.dot_dimension_numbers<[1], [0], [0], [1], [0, 0, 1, 1], [], []>} : vector<8x40xbf16>, vector<40x16xbf16>, vector<8x16xf32> -> vector<8x16xf32>
    %108 = vector.broadcast %48 : vector<8x1xf32> to vector<8x16xf32>
    %109 = arith.addf %107, %108 : vector<8x16xf32>
    %c7_121 = arith.constant 7 : index
    %c0_122 = arith.constant 0 : index
    %c0_123 = arith.constant 0 : index
    %110 = vector.load %arg8[%c7_121, %c0_122, %c0_123] : memref<8x8x16xf32, #tpu.memory_space<vmem>>, vector<1x8x16xf32>
    %111 = vector.shape_cast %110 : vector<1x8x16xf32> to vector<8x16xf32>
    %112 = vector.shape_cast %109 : vector<8x16xf32> to vector<1x8x16xf32>
    tpu.vector_store %arg8[%c7_121, %c0_122, %c0_123], %112 {strides = array<i32>} : memref<8x8x16xf32, #tpu.memory_space<vmem>>, vector<1x8x16xf32>,
    return
  }
  func.func @transform_0(%arg0: i32) -> (i32, i32, i32) {
    %c0_i32 = arith.constant 0 : i32
    %c0_i32_0 = arith.constant 0 : i32
    %c0_i32_1 = arith.constant 0 : i32
    return %arg0, %c0_i32, %c0_i32_0 : i32, i32, i32
  }
  func.func @transform_1(%arg0: i32) -> (i32, i32) {
    %c0_i32 = arith.constant 0 : i32
    %c0_i32_0 = arith.constant 0 : i32
    %c0_i32_1 = arith.constant 0 : i32
    return %c0_i32, %c0_i32_0 : i32, i32
  }
  func.func @transform_2(%arg0: i32) -> (i32, i32) {
    %c0_i32 = arith.constant 0 : i32
    %c0_i32_0 = arith.constant 0 : i32
    %c0_i32_1 = arith.constant 0 : i32
    return %c0_i32, %c0_i32_0 : i32, i32
  }
  func.func @transform_3(%arg0: i32) -> (i32, i32) {
    %c0_i32 = arith.constant 0 : i32
    %c0_i32_0 = arith.constant 0 : i32
    %c0_i32_1 = arith.constant 0 : i32
    return %c0_i32, %c0_i32_0 : i32, i32
  }
  func.func @transform_4(%arg0: i32) -> (i32, i32) {
    %c0_i32 = arith.constant 0 : i32
    %c0_i32_0 = arith.constant 0 : i32
    %c0_i32_1 = arith.constant 0 : i32
    return %c0_i32, %c0_i32_0 : i32, i32
  }
  func.func @transform_5(%arg0: i32) -> (i32, i32) {
    %c0_i32 = arith.constant 0 : i32
    %c0_i32_0 = arith.constant 0 : i32
    %c0_i32_1 = arith.constant 0 : i32
    return %c0_i32, %c0_i32_0 : i32, i32
  }
  func.func @transform_6(%arg0: i32) -> (i32, i32) {
    %c0_i32 = arith.constant 0 : i32
    %c0_i32_0 = arith.constant 0 : i32
    %c0_i32_1 = arith.constant 0 : i32
    return %c0_i32, %c0_i32_0 : i32, i32
  }
  func.func @transform_7(%arg0: i32) -> (i32, i32, i32) {
    %c0_i32 = arith.constant 0 : i32
    %c0_i32_0 = arith.constant 0 : i32
    %c0_i32_1 = arith.constant 0 : i32
    return %arg0, %c0_i32, %c0_i32_0 : i32, i32, i32
  }
}

</mosaic_0001>

<bundles_post_ra>
// kernel: tpu_custom_call.1
= control target key start
LH: loop header
LB: loop body
LE: loop exit
PB: predicated region body
PF: predicated region fallthrough
CT: control target
= control target key end

     0   :  { %12 = vsyncpa [#allocation5], 0  ;;  %s3042_s0 = inlined_call_operand.hbm [shape: f32[16,4,16], index: 0, kind: input, shape index: {}]   ;;  %s3043_s1 = inlined_call_operand.vmem [shape: f32[4,1], index: 1, kind: input, shape index: {}]   ;;  %s3044_s2 = inlined_call_operand.vmem [shape: f32[4,1], index: 2, kind: input, shape index: {}]   ;;  %s3045_s3 = inlined_call_operand.vmem [shape: f32[4,1], index: 3, kind: input, shape index: {}]   ;;  %s3046_s4 = inlined_call_operand.vmem [shape: f32[4,1], index: 4, kind: input, shape index: {}]   ;;  %s3047_s5 = inlined_call_operand.vmem [shape: bf16[8,40], index: 5, kind: input, shape index: {}]   ;;  %s3048_s6 = inlined_call_operand.vmem [shape: f32[8,1], index: 6, kind: input, shape index: {}]   ;;  %s3049_s7 = inlined_call_operand.hbm [shape: f32[16,8,16], index: 7, kind: output, shape index: {}]  }
   0x1   :  { %14 = vsyncpa [#allocation5 + $0x1], 0 }
   0x2   :  { %15 = vsyncpa [#allocation6], 0 }
   0x3   :  { %17 = vsyncpa [#allocation6 + $0x1], 0  ;;  %s2560_s24 = smov 0   ;;  %s2562_s25 = smov 0  }
   0x4   :  { %s2564_s26 = smov 0   ;;  %s2566_s27 = smov 0  }
   0x5 LB: > { %s2581_s28 = sadd.s32 4294967295, %s2499_s27   ;;  %s2067_s29 = sadd.s32 4294967294, %s2499_s27   ;;  %s2499_s27 = sphi %s2566_s27, %s3062_s27   ;;  %s2495_s26 = sphi %s2564_s26, %s3061_s26   ;;  %s2491_s25 = sphi %s2562_s25, %s3060_s25   ;;  %s2487_s24 = sphi %s2560_s24, %s3059_s24  }
   0x6   : > { %s2585_s30 = sadd.s32 1, %s2499_s27   ;;  %s30_s8 = sadd.s32 1, %s2495_s26 }
   0x7   : > { %s27_s9 = ssub.s32 %s2499_s27, %s2585_s30  ;;  %p37_p0 = scmp.ne.s32.totalorder %s2495_s26, %s2491_s25 }
   0x8   : > { %p28_p1 = scmp.eq.s32.totalorder %s27_s9, 0  ;;  %p38_p2 = scmp.eq.s32.totalorder %s2499_s27, 0 }
   0x9   : > { %p43_p3 = scmp.ne.s32.totalorder %s2491_s25, %s2487_s24  ;;  %p44_p4 = scmp.eq.s32.totalorder %s2581_s28, 0 }
   0xa   : > { %s2597_s10 = scalar_select %p28_p1, %s2495_s26, %s30_s8  }
   0xb   : > { %p2599_p5 = por %p38_p2, %p37_p0  ;;  %p2603_p6 = por %p44_p4, %p43_p3 }
   0xc   : > { %p193_p7 = scmp.eq.s32.totalorder %s2581_s28, 1  ;;  %p199_p8 = scmp.eq.s32.totalorder %s2067_s29, 1 }
   0xd   : > { %p2294_p10 = scmp.lt.s32.totalorder %s2499_s27, 2  ;;  %s237_s15 = sand.u32 1, %s2495_s26  }
   0xe   : > { %p2610_p11 = por %p193_p7, %p37_p0  ;;  %p2614_p12 = por %p199_p8, %p43_p3 }
   0xf   : > { %s2160_s16 = sshll.u32 %s2499_s27, 9  ;;  %s2070_s17 = sshll.u32 %s237_s15, 5 }
  0x10   : > { %s3053_s13 = scalar_select %p2610_p11, 1, 0 }
  0x11   : > { %s3054_s14 = scalar_select %p2614_p12, 1, 0 }
  0x12   : > { %s2623_s20 = scalar_lea.hbm %s3042_s0, %s2160_s16  ;;  %s241_s21 = scalar_lea.vmem [#allocation4], %s2070_s17 }
  0x13   : > { %s248_s22 = sshll.u32 %s241_s21, 4  ;;  %p2627_p13 = pnand %p2294_p10, %p2599_p5  ;;  %s2631_s22 = int_to_ptr.vmem [resolvable:$true] %s248_s22 }
  0x14   : > { %s2633_s29 = scalar_lea.sflag [#allocation5], %s237_s15  ;;  %s2403_s8 = scalar_lea.hbm %s2623_s20, 512 }
  0x15   : > { %p2404_p0 = scmp.ne.s32.totalorder %s2623_s20, %s2403_s8  ;;  %p2405_p1 = pneg %p2627_p13 }
  0x16   : > { %s2408_s16 = scalar_lea.hbm %s3042_s0, 1024  ;;  %p2409_p4 = scmp.lt.u32.totalorder %s2623_s20, %s3042_s0 }
  0x17   : > { %p2406_p2 = pnand %p2405_p1, %p2404_p0  ;;  %p2410_p5 = scmp.lt.u32.totalorder %s2408_s16, %s2403_s8 }
  0x18   : > { %p2412_p8 = scmp.lt.u32.totalorder %s2403_s8, %s2623_s20 }
  0x19   : > { %p2407_p3 = pneg %p2406_p2  ;;  %p2411_p7 = por %p2410_p5, %p2409_p4 }
  0x1b   : > { %p2413_p10 = por %p2412_p8, %p2411_p7 }
  0x1d   : > { %p2414_p9 = pnand %p2413_p10, %p2407_p3 }
  0x1f   : > { %2417 = shalt.err (!%p2414_p9)
}
  0x20   : > { %s2418_s15 = scalar_lea.vmem %s2631_s22, 512  ;;  %s2501_s19 = smov [#allocation4]  }
  0x21   : > { %p2419_p0 = scmp.ne.s32.totalorder %s2631_s22, %s2418_s15  ;;  %s2423_s21 = sshll.u32 %s2501_s19, 4  ;;  %s2424_s21 = int_to_ptr.vmem [resolvable:$false] %s2423_s21 }
  0x22   : > { %s2425_s9 = scalar_lea.vmem %s2424_s21, 1024  ;;  %p2426_p11 = scmp.lt.s32.totalorder %s2631_s22, %s2424_s21 }
  0x23   : > { %p2421_p2 = pnand %p2419_p0, %p2405_p1  ;;  %p2427_p4 = scmp.lt.s32.totalorder %s2425_s9, %s2418_s15 }
  0x25   : > { %p2422_p12 = pneg %p2421_p2  ;;  %p2428_p5 = por %p2427_p4, %p2426_p11 }
  0x27   : > { %p2429_p7 = pnand %p2428_p5, %p2422_p12 }
  0x29   : > { %2432 = shalt.err (!%p2429_p7)
}
  0x2a   : > { %s2502_s8 = smov 64   ;;  %s2503_s11 = smov 4  }
  0x2b   : > { %2289 = dma.hbm_to_vmem [thread:$0]  (!%p2627_p13), %s2623_s20, 512, %s2631_s22, %s2633_s29, %s2502_s8, %s2502_s8, %s2503_s11  }
  0x2c   : > { %p2073_p9 = scmp.ge.s32.totalorder %s2499_s27, 1  ;;  %p256_p1 = scmp.lt.s32.totalorder %s2499_s27, 3 }
  0x2e   : > { %p257_p3 = pnand %p2073_p9, %p256_p1 }
  0x2f   : > { %s2664_s16 = sand.u32 (!%p257_p3), 1, %s2491_s25  }
  0x30   : > { %260 = sbr.rel (%p257_p3) target bundleno = 807 (0x327), region = 48  ;;  %s2074_s17 = sshll.u32 (!%p257_p3), %s2664_s16, 5 }
  0x31   : > { %s263_s18 = scalar_lea.sflag (!%p257_p3), [#allocation5], %s2664_s16  ;;  %s2668_s15 = scalar_lea.vmem (!%p257_p3), [#allocation4], %s2074_s17 }
  0x37   : > { %2478 = dma.done.wait (%p2603_p6), %s263_s18, 512  }
  0x38   : > { %2480 = vsyncadd (%p2603_p6), %s263_s18, 4294966784  ;;  %v2504_v0 = vmov 0   ;;  %v308_v1 = vld [vmem:[%s3043_s1] sm:$0xf]  ;;  %vm380_vm0 = vcmask 25600   ;;  %vm389_vm1 = vcmask 189600   ;;  %v417_v7 = vlaneseq }
  0x39   : > { %2345 = vset.pattern.permute.xlu0 %v2504_v0  ;;  %2346 = vset.pattern.permute.xlu1 %v2504_v0  ;;  %v358_v2 = vld [vmem:[%s3046_s4] sm:$0xf]  ;;  %383 = vst.msk [vmem:[#allocation2 + $0x4] sm:$0x3] %vm380_vm0, %v2504_v0  ;;  %381 = vst.msk [vmem:[#allocation2] sm:$0x3] %vm380_vm0, %v2504_v0 }
  0x3a   : > { %311 = vperm.xlu0 %2345, %v308_v1   ;;  %v322_v3 = vld [vmem:[%s3044_s2] sm:$0xf]  ;;  %361 = vperm.xlu1 %2346, %v358_v2   ;;  %382 = vst.msk [vmem:[#allocation2 + $0x2] sm:$0x3] %vm380_vm0, %v2504_v0  ;;  %384 = vst.msk [vmem:[#allocation2 + $0x6] sm:$0x3] %vm380_vm0, %v2504_v0 }
  0x3b   : > { %v344_v4 = vld [vmem:[%s3045_s3] sm:$0xf]  ;;  %385 = vst.msk [vmem:[#allocation2 + $0x8] sm:$0x3] %vm380_vm0, %v2504_v0  ;;  %386 = vst.msk [vmem:[#allocation2 + $0xa] sm:$0x3] %vm380_vm0, %v2504_v0 }
  0x3c   : > { %387 = vst.msk [vmem:[#allocation2 + $0xc] sm:$0x3] %vm380_vm0, %v2504_v0  ;;  %388 = vst.msk [vmem:[#allocation2 + $0xe] sm:$0x3] %vm380_vm0, %v2504_v0  ;;  %v2505_v5 = vmov 1983009808  }
  0x3d   : > { %392 = vst.msk [vmem:[#allocation2 + $0x4] sm:$0x3] %vm389_vm1, %v2504_v0  ;;  %390 = vst.msk [vmem:[#allocation2] sm:$0x3] %vm389_vm1, %v2504_v0  ;;  %v415_v6 = vunpack.c.l.s4 %v2505_v5  ;;  %v302_v8 = vld [vmem:[%s2668_s15 + $0x8] sm:$0xf] }
  0x3e   : > { %325 = vperm.xlu0 %2345, %v322_v3   ;;  %391 = vst.msk [vmem:[#allocation2 + $0x2] sm:$0x3] %vm389_vm1, %v2504_v0  ;;  %393 = vst.msk [vmem:[#allocation2 + $0x6] sm:$0x3] %vm389_vm1, %v2504_v0  ;;  %v300_v9 = vld [vmem:[%s2668_s15] sm:$0xf] }
  0x3f   : > { %394 = vst.msk [vmem:[#allocation2 + $0x8] sm:$0x3] %vm389_vm1, %v2504_v0  ;;  %395 = vst.msk [vmem:[#allocation2 + $0xa] sm:$0x3] %vm389_vm1, %v2504_v0  ;;  %v416_v11 = vunpack.c.0.s8 %v415_v6  ;;  %v418_v12 = vshrl.u32 %v417_v7, 7  ;;  %vm624_vm2 = vcmask 125954  }
  0x40   : > { %396 = vst.msk [vmem:[#allocation2 + $0xc] sm:$0x3] %vm389_vm1, %v2504_v0  ;;  %397 = vst.msk [vmem:[#allocation2 + $0xe] sm:$0x3] %vm389_vm1, %v2504_v0  ;;  %v304_v13 = vld [vmem:[%s2668_s15 + $0x10] sm:$0xf] }
  0x41   : > { %v301_v14 = vld [vmem:[%s2668_s15 + $0x4] sm:$0xf]  ;;  %v306_v15 = vld [vmem:[%s2668_s15 + $0x18] sm:$0xf]  ;;  %v303_v16 = vld [vmem:[%s2668_s15 + $0xc] sm:$0xf]  ;;  %v2702_v24 = vsub.s32 %v416_v11, %v418_v12 }
  0x42   : > { %347 = vperm.xlu0 %2345, %v344_v4   ;;  %v305_v17 = vld [vmem:[%s2668_s15 + $0x14] sm:$0xf]  ;;  %v307_v22 = vld [vmem:[%s2668_s15 + $0x1c] sm:$0xf]  ;;  %s2506_s8 = smov 4   ;;  %vm494_vm3 = vcmask 156704  }
  0x43   : > { %vm511_vm4 = vcmask 123904   ;;  %s2507_s11 = smov 126   ;;  %s2508_s17 = smov 124   ;;  %vm2516_vm5 = vmmov 0   ;;  %vm1472_vm6 = vcmask 1043456   ;;  %vm1468_vm7 = vcmask 326656  }
  0x44   : > { %s2509_s18 = smov 122   ;;  %s2510_s15 = smov 120   ;;  %vm1516_vm8 = vcmask 130048  }
  0x45   : > { %s2511_s20 = smov 127   ;;  %s2513_s22 = smov 125  }
  0x46   : > { %s2514_s23 = smov 123   ;;  %s2515_s29 = smov 121  }
  0x47   : > { %p3056_p11 = scmp.ne.s32.totalorder %s3053_s13, 0 }
  0xb9   : > { %v312_v10 = vpop.permute.xlu0 %311  ;;  %v362_v41 = vpop.permute.xlu1 %361 }
  0xba   : > { %v316_v18 = vmul.f32 %v312_v10, %v302_v8  ;;  %v314_v19 = vmul.f32 %v312_v10, %v300_v9  ;;  %v318_v20 = vmul.f32 %v312_v10, %v304_v13  ;;  %v315_v21 = vmul.f32 %v312_v10, %v301_v14 }
  0xbb   : > { %v320_v25 = vmul.f32 %v312_v10, %v306_v15  ;;  %v317_v26 = vmul.f32 %v312_v10, %v303_v16  ;;  %v319_v27 = vmul.f32 %v312_v10, %v305_v17  ;;  %v321_v35 = vmul.f32 %v312_v10, %v307_v22 }
  0xbd   : > { %v326_v23 = vpop.permute.xlu0 %325 }
  0xbe   : > { %v330_v28 = vadd.f32 %v326_v23, %v316_v18  ;;  %v328_v29 = vadd.f32 %v326_v23, %v314_v19  ;;  %v332_v30 = vadd.f32 %v326_v23, %v318_v20  ;;  %v329_v31 = vadd.f32 %v326_v23, %v315_v21 }
  0xbf   : > { %v334_v32 = vadd.f32 %v326_v23, %v320_v25  ;;  %v331_v33 = vadd.f32 %v326_v23, %v317_v26  ;;  %v333_v34 = vadd.f32 %v326_v23, %v319_v27  ;;  %v335_v45 = vadd.f32 %v326_v23, %v321_v35 }
  0xc0   : > { %v338_v36 = vmax.f32 %v330_v28, 0.0  ;;  %v336_v37 = vmax.f32 %v328_v29, 0.0  ;;  %v340_v38 = vmax.f32 %v332_v30, 0.0  ;;  %v337_v39 = vmax.f32 %v329_v31, 0.0 }
  0xc1   : > { %v348_v40 = vpop.permute.xlu0 %347  ;;  %v342_v42 = vmax.f32 %v334_v32, 0.0  ;;  %v339_v43 = vmax.f32 %v331_v33, 0.0  ;;  %v341_v44 = vmax.f32 %v333_v34, 0.0  ;;  %v343_v53 = vmax.f32 %v335_v45, 0.0 }
  0xc2   : > { %v400_v46 = vpack.c.bf16 %v338_v36, %v338_v36  ;;  %v398_v47 = vpack.c.bf16 %v336_v37, %v336_v37  ;;  %v402_v48 = vpack.c.bf16 %v340_v38, %v340_v38  ;;  %v399_v49 = vpack.c.bf16 %v337_v39, %v337_v39 }
  0xc3   : > { %v404_v54 = vpack.c.bf16 %v342_v42, %v342_v42  ;;  %v401_v55 = vpack.c.bf16 %v339_v43, %v339_v43  ;;  %v403_v59 = vpack.c.bf16 %v341_v44, %v341_v44  ;;  %v405_v61 = vpack.c.bf16 %v343_v53, %v343_v53 }
  0xc4   : > { %v434_v50 = vrot.slane %v400_v46, %v2702_v24  ;;  %v420_v51 = vrot.slane %v398_v47, %v2702_v24  ;;  %v448_v52 = vrot.slane %v402_v48, %v2702_v24  ;;  %v427_v56 = vrot.slane %v399_v49, %v2702_v24 }
  0xc5   : > { %v462_v57 = vrot.slane %v404_v54, %v2702_v24  ;;  %v441_v58 = vrot.slane %v401_v55, %v2702_v24  ;;  %v455_v60 = vrot.slane %v403_v59, %v2702_v24  ;;  %v469_v62 = vrot.slane %v405_v61, %v2702_v24 }
  0xc6   : > { %474 = vrot.lane.b32.xlu0 %v434_v50, %s2506_s8  ;;  %470 = vrot.lane.b32.xlu1 %v420_v51, %s2506_s8  ;;  %v2512_v28 = vmov 0.0  }
  0xc7   : > { %2202 = vmatprep.subr.bf16.mxu0 %v2512_v28  ;;  %2212 = vmatprep.subr.bf16.mxu1 %v2512_v28 }
  0xc8   : > { %2208 = vmatprep.mubr.msk.bf16.mxu0 %vm2516_vm5, %v2512_v28  ;;  %2218 = vmatprep.mubr.msk.bf16.mxu1 %vm2516_vm5, %v2512_v28 }
  0xca   : > { %478 = vrot.lane.b32.xlu0 %v448_v52, %s2506_s8  ;;  %472 = vrot.lane.b32.xlu1 %v427_v56, %s2506_s8 }
  0xce   : > { %482 = vrot.lane.b32.xlu0 %v462_v57, %s2506_s8  ;;  %476 = vrot.lane.b32.xlu1 %v441_v58, %s2506_s8 }
  0xd2   : > { %480 = vrot.lane.b32.xlu1 %v455_v60, %s2506_s8 }
  0xd6   : > { %484 = vrot.lane.b32.xlu1 %v469_v62, %s2506_s8  ;;  %s2075_s8 = sshll.u32 %s2664_s16, 6 }
 0x138   : > { %v475_v63 = vpop.permute.xlu0 %474  ;;  %v471_v0 = vpop.permute.xlu1 %470 }
 0x139   : > { %497 = vst.msk [vmem:[#allocation2 + $0x4] sm:$0x3] %vm494_vm3, %v475_v63  ;;  %495 = vst.msk [vmem:[#allocation2] sm:$0x3] %vm494_vm3, %v471_v0 }
 0x13c   : > { %v479_v1 = vpop.permute.xlu0 %478  ;;  %v473_v2 = vpop.permute.xlu1 %472 }
 0x13d   : > { %499 = vst.msk [vmem:[#allocation2 + $0x8] sm:$0x3] %vm494_vm3, %v479_v1  ;;  %496 = vst.msk [vmem:[#allocation2 + $0x2] sm:$0x3] %vm494_vm3, %v473_v2 }
 0x140   : > { %v505_v3 = vld [vmem:[#allocation2 + $0x4] sm:$0x3]  ;;  %v503_v4 = vld [vmem:[#allocation2] sm:$0x3]  ;;  %v483_v5 = vpop.permute.xlu0 %482  ;;  %v477_v6 = vpop.permute.xlu1 %476 }
 0x141   : > { %514 = vst.msk [vmem:[#allocation3 + $0x28] sm:$0x3] %vm511_vm4, %v505_v3  ;;  %512 = vst.msk [vmem:[#allocation3] sm:$0x3] %vm511_vm4, %v503_v4 }
 0x142   : > { %501 = vst.msk [vmem:[#allocation2 + $0xc] sm:$0x3] %vm494_vm3, %v483_v5  ;;  %498 = vst.msk [vmem:[#allocation2 + $0x6] sm:$0x3] %vm494_vm3, %v477_v6 }
 0x143   : > { %v2076_v7 = vld.sshfl [vmem:[#allocation2] sm:$0x3 pattern:$0x76325410] }
 0x144   : > { %705 = vrot.lane.b32.xlu0 %v2076_v7, %s2507_s11  ;;  %v507_v8 = vld [vmem:[#allocation2 + $0x8] sm:$0x3]  ;;  %v504_v9 = vld [vmem:[#allocation2 + $0x2] sm:$0x3]  ;;  %v481_v10 = vpop.permute.xlu1 %480 }
 0x145   : > { %516 = vst.msk [vmem:[#allocation3 + $0x50] sm:$0x3] %vm511_vm4, %v507_v8  ;;  %513 = vst.msk [vmem:[#allocation3 + $0x14] sm:$0x3] %vm511_vm4, %v504_v9 }
 0x146   : > { %500 = vst.msk [vmem:[#allocation2 + $0xa] sm:$0x3] %vm494_vm3, %v481_v10  ;;  %v2077_v11 = vld.sshfl [vmem:[#allocation2 + $0x2] sm:$0x3 pattern:$0x76325410] }
 0x147   : > { %707 = vrot.lane.b32.xlu1 %v2077_v11, %s2507_s11  ;;  %v2078_v17 = vld.sshfl [vmem:[#allocation2 + $0x4] sm:$0x3 pattern:$0x76325410] }
 0x148   : > { %921 = vrot.lane.b32.xlu0 %v2076_v7, %s2508_s17  ;;  %v485_v14 = vpop.permute.xlu1 %484  ;;  %v2080_v19 = vld.sshfl [vmem:[#allocation2 + $0x8] sm:$0x3 pattern:$0x76325410] }
 0x149   : > { %v509_v12 = vld [vmem:[#allocation2 + $0xc] sm:$0x3]  ;;  %v506_v13 = vld [vmem:[#allocation2 + $0x6] sm:$0x3]  ;;  %502 = vst.msk [vmem:[#allocation2 + $0xe] sm:$0x3] %vm494_vm3, %v485_v14 }
 0x14a   : > { %518 = vst.msk [vmem:[#allocation3 + $0x78] sm:$0x3] %vm511_vm4, %v509_v12  ;;  %515 = vst.msk [vmem:[#allocation3 + $0x3c] sm:$0x3] %vm511_vm4, %v506_v13 }
 0x14b   : > { %923 = vrot.lane.b32.xlu1 %v2077_v11, %s2508_s17  ;;  %v2079_v18 = vld.sshfl [vmem:[#allocation2 + $0x6] sm:$0x3 pattern:$0x76325410] }
 0x14c   : > { %1137 = vrot.lane.b32.xlu0 %v2076_v7, %s2509_s18  ;;  %v2751_v21 = vld.sshfl [vmem:[#allocation2 + $0xc] sm:$0x3 pattern:$0x76325410] }
 0x14d   : > { %v508_v15 = vld [vmem:[#allocation2 + $0xa] sm:$0x3]  ;;  %v2347_v23 = vld [vmem:[#allocation2] ss:$0 sps:$4 sm:$0x33]  }
 0x14e   : > { %517 = vst.msk [vmem:[#allocation3 + $0x64] sm:$0x3] %vm511_vm4, %v508_v15  ;;  %v2081_v20 = vld.sshfl [vmem:[#allocation2 + $0xa] sm:$0x3 pattern:$0x76325410]  ;;  %v543_v25 = vrot.slane %v2347_v23, %v2702_v24 }
 0x14f   : > { %1139 = vrot.lane.b32.xlu1 %v2077_v11, %s2509_s18  ;;  %v2348_v26 = vld [vmem:[#allocation2] ss:$0 sps:$4 sm:$0x33]   ;;  %v2349_v27 = vld [vmem:[#allocation2 + $0x2] ss:$0 sps:$4 sm:$0x33]  }
 0x150   : > { %1353 = vrot.lane.b32.xlu0 %v2076_v7, %s2510_s15  ;;  %v510_v16 = vld [vmem:[#allocation2 + $0xe] sm:$0x3]  ;;  %v760_v29 = vrot.slane %v2348_v26, %v2702_v24  ;;  %v551_v30 = vrot.slane %v2349_v27, %v2702_v24  ;;  %v2350_v31 = vld [vmem:[#allocation2] ss:$0 sps:$4 sm:$0x33]  }
 0x151   : > { %519 = vst.msk [vmem:[#allocation3 + $0x8c] sm:$0x3] %vm511_vm4, %v510_v16  ;;  %v2756_v22 = vld.sshfl [vmem:[#allocation2 + $0xe] sm:$0x3 pattern:$0x76325410]  ;;  %v976_v33 = vrot.slane %v2350_v31, %v2702_v24 }
 0x152   : > { %v2351_v32 = vld [vmem:[#allocation2 + $0x2] ss:$0 sps:$4 sm:$0x33]   ;;  %v2352_v35 = vld [vmem:[#allocation2] ss:$0 sps:$4 sm:$0x33]  }
 0x153   : > { %1355 = vrot.lane.b32.xlu1 %v2077_v11, %s2510_s15  ;;  %v768_v34 = vrot.slane %v2351_v32, %v2702_v24  ;;  %v2353_v36 = vld [vmem:[#allocation2 + $0x2] ss:$0 sps:$4 sm:$0x33]   ;;  %v1192_v37 = vrot.slane %v2352_v35, %v2702_v24  ;;  %v2354_v39 = vld [vmem:[#allocation2 + $0x4] ss:$0 sps:$4 sm:$0x33]  }
 0x154   : > { %709 = vrot.lane.b32.xlu0 %v2078_v17, %s2507_s11  ;;  %v984_v38 = vrot.slane %v2353_v36, %v2702_v24  ;;  %v2355_v40 = vld [vmem:[#allocation2 + $0x2] ss:$0 sps:$4 sm:$0x33]   ;;  %v559_v41 = vrot.slane %v2354_v39, %v2702_v24  ;;  %v2356_v43 = vld [vmem:[#allocation2 + $0x4] ss:$0 sps:$4 sm:$0x33]  }
 0x155   : > { %v1200_v42 = vrot.slane %v2355_v40, %v2702_v24  ;;  %v2357_v44 = vld [vmem:[#allocation2 + $0x6] ss:$0 sps:$4 sm:$0x33]   ;;  %v776_v45 = vrot.slane %v2356_v43, %v2702_v24  ;;  %v2358_v47 = vld [vmem:[#allocation2 + $0x4] ss:$0 sps:$4 sm:$0x33]  }
 0x156   : > { %v567_v46 = vrot.slane %v2357_v44, %v2702_v24  ;;  %v2359_v48 = vld [vmem:[#allocation2 + $0x6] ss:$0 sps:$4 sm:$0x33]   ;;  %v992_v49 = vrot.slane %v2358_v47, %v2702_v24  ;;  %v2360_v51 = vld [vmem:[#allocation2 + $0x4] ss:$0 sps:$4 sm:$0x33]  }
 0x157   : > { %711 = vrot.lane.b32.xlu1 %v2079_v18, %s2507_s11  ;;  %v784_v50 = vrot.slane %v2359_v48, %v2702_v24  ;;  %v2361_v52 = vld [vmem:[#allocation2 + $0x6] ss:$0 sps:$4 sm:$0x33]   ;;  %v1208_v53 = vrot.slane %v2360_v51, %v2702_v24  ;;  %v2362_v55 = vld [vmem:[#allocation2 + $0x8] ss:$0 sps:$4 sm:$0x33]  }
 0x158   : > { %925 = vrot.lane.b32.xlu0 %v2078_v17, %s2508_s17  ;;  %v1000_v54 = vrot.slane %v2361_v52, %v2702_v24  ;;  %v2363_v56 = vld [vmem:[#allocation2 + $0x6] ss:$0 sps:$4 sm:$0x33]   ;;  %v575_v57 = vrot.slane %v2362_v55, %v2702_v24  ;;  %v2364_v59 = vld [vmem:[#allocation2 + $0x8] ss:$0 sps:$4 sm:$0x33]  }
 0x159   : > { %v1216_v58 = vrot.slane %v2363_v56, %v2702_v24  ;;  %v2365_v60 = vld [vmem:[#allocation2 + $0xa] ss:$0 sps:$4 sm:$0x33]   ;;  %v792_v61 = vrot.slane %v2364_v59, %v2702_v24  ;;  %v2366_v63 = vld [vmem:[#allocation2 + $0x8] ss:$0 sps:$4 sm:$0x33]  }
 0x15a   : > { %v583_v62 = vrot.slane %v2365_v60, %v2702_v24  ;;  %v2367_v0 = vld [vmem:[#allocation2 + $0xa] ss:$0 sps:$4 sm:$0x33]   ;;  %v1008_v1 = vrot.slane %v2366_v63, %v2702_v24  ;;  %v2368_v3 = vld [vmem:[#allocation2 + $0x8] ss:$0 sps:$4 sm:$0x33]  }
 0x15b   : > { %927 = vrot.lane.b32.xlu1 %v2079_v18, %s2508_s17  ;;  %v800_v2 = vrot.slane %v2367_v0, %v2702_v24  ;;  %v2369_v4 = vld [vmem:[#allocation2 + $0xa] ss:$0 sps:$4 sm:$0x33]   ;;  %v1224_v5 = vrot.slane %v2368_v3, %v2702_v24  ;;  %v2370_v7 = vld [vmem:[#allocation2 + $0xc] ss:$0 sps:$4 sm:$0x33]  }
 0x15c   : > { %1141 = vrot.lane.b32.xlu0 %v2078_v17, %s2509_s18  ;;  %v1016_v6 = vrot.slane %v2369_v4, %v2702_v24  ;;  %v2371_v8 = vld [vmem:[#allocation2 + $0xa] ss:$0 sps:$4 sm:$0x33]   ;;  %v591_v9 = vrot.slane %v2370_v7, %v2702_v24  ;;  %v2372_v11 = vld [vmem:[#allocation2 + $0xc] ss:$0 sps:$4 sm:$0x33]  }
 0x15d   : > { %v1232_v10 = vrot.slane %v2371_v8, %v2702_v24  ;;  %v2373_v12 = vld [vmem:[#allocation2 + $0xe] ss:$0 sps:$4 sm:$0x33]   ;;  %v808_v13 = vrot.slane %v2372_v11, %v2702_v24  ;;  %v2374_v15 = vld [vmem:[#allocation2 + $0xc] ss:$0 sps:$4 sm:$0x33]  }
 0x15e   : > { %v599_v14 = vrot.slane %v2373_v12, %v2702_v24  ;;  %v2375_v16 = vld [vmem:[#allocation2 + $0xe] ss:$0 sps:$4 sm:$0x33]  }
 0x15f   : > { %1143 = vrot.lane.b32.xlu1 %v2079_v18, %s2509_s18  ;;  %v2377_v23 = vld [vmem:[#allocation2 + $0xe] ss:$0 sps:$4 sm:$0x33]  }
 0x160   : > { %1357 = vrot.lane.b32.xlu0 %v2078_v17, %s2510_s15 }
 0x163   : > { %1359 = vrot.lane.b32.xlu1 %v2079_v18, %s2510_s15  ;;  %v1024_v18 = vrot.slane %v2374_v15, %v2702_v24 }
 0x164   : > { %713 = vrot.lane.b32.xlu0 %v2080_v19, %s2507_s11 }
 0x167   : > { %715 = vrot.lane.b32.xlu1 %v2081_v20, %s2507_s11 }
 0x168   : > { %929 = vrot.lane.b32.xlu0 %v2080_v19, %s2508_s17 }
 0x16b   : > { %931 = vrot.lane.b32.xlu1 %v2081_v20, %s2508_s17 }
 0x16c   : > { %1145 = vrot.lane.b32.xlu0 %v2080_v19, %s2509_s18 }
 0x16f   : > { %1147 = vrot.lane.b32.xlu1 %v2081_v20, %s2509_s18 }
 0x170   : > { %1361 = vrot.lane.b32.xlu0 %v2080_v19, %s2510_s15  ;;  %v816_v19 = vrot.slane %v2375_v16, %v2702_v24 }
 0x173   : > { %1363 = vrot.lane.b32.xlu1 %v2081_v20, %s2510_s15  ;;  %v2376_v20 = vld [vmem:[#allocation2 + $0xc] ss:$0 sps:$4 sm:$0x33]  }
 0x174   : > { %717 = vrot.lane.b32.xlu0 %v2751_v21, %s2507_s11  ;;  %v1240_v27 = vrot.slane %v2376_v20, %v2702_v24 }
 0x177   : > { %719 = vrot.lane.b32.xlu1 %v2756_v22, %s2507_s11  ;;  %s2973_s11 = scalar_lea.vmem [#allocation7], %s2075_s8 }
 0x178   : > { %933 = vrot.lane.b32.xlu0 %v2751_v21, %s2508_s17 }
 0x17b   : > { %935 = vrot.lane.b32.xlu1 %v2756_v22, %s2508_s17  ;;  %s2169_s17 = sshll.u32 %s2581_s28, 10  ;;  %s1981_s28 = scalar_lea.sflag [#allocation6], %s2664_s16 }
 0x17c   : > { %1149 = vrot.lane.b32.xlu0 %v2751_v21, %s2509_s18 }
 0x17f   : > { %1151 = vrot.lane.b32.xlu1 %v2756_v22, %s2509_s18  ;;  %s1994_s18 = sshll.u32 %s2973_s11, 4  ;;  %s2996_s18 = int_to_ptr.vmem [resolvable:$true] %s1994_s18 }
 0x180   : > { %600 = vrot.lane.b32.xlu0 %v543_v25, %s2511_s20 }
 0x183   : > { %602 = vrot.lane.b32.xlu1 %v551_v30, %s2511_s20  ;;  %v2378_v30 = vld [vmem:[#allocation2 + $0xe] ss:$0 sps:$4 sm:$0x33]  }
 0x184   : > { %817 = vrot.lane.b32.xlu0 %v760_v29, %s2513_s22  ;;  %v1032_v29 = vrot.slane %v2377_v23, %v2702_v24 }
 0x187   : > { %819 = vrot.lane.b32.xlu1 %v768_v34, %s2513_s22  ;;  %v1442_v34 = vld [vmem:[%s3048_s6] sm:$0xff] }
 0x188   : > { %1033 = vrot.lane.b32.xlu0 %v976_v33, %s2514_s23  ;;  %v1248_v33 = vrot.slane %v2378_v30, %v2702_v24 }
 0x18b   : > { %1035 = vrot.lane.b32.xlu1 %v984_v38, %s2514_s23 }
 0x18c   : > { %1249 = vrot.lane.b32.xlu0 %v1192_v37, %s2515_s29 }
 0x18f   : > { %1251 = vrot.lane.b32.xlu1 %v1200_v42, %s2515_s29 }
 0x190   : > { %604 = vrot.lane.b32.xlu0 %v559_v41, %s2511_s20 }
 0x193   : > { %606 = vrot.lane.b32.xlu1 %v567_v46, %s2511_s20 }
 0x194   : > { %821 = vrot.lane.b32.xlu0 %v776_v45, %s2513_s22 }
 0x197   : > { %823 = vrot.lane.b32.xlu1 %v784_v50, %s2513_s22 }
 0x198   : > { %1037 = vrot.lane.b32.xlu0 %v992_v49, %s2514_s23 }
 0x19b   : > { %1039 = vrot.lane.b32.xlu1 %v1000_v54, %s2514_s23 }
 0x19c   : > { %1253 = vrot.lane.b32.xlu0 %v1208_v53, %s2515_s29 }
 0x19f   : > { %1255 = vrot.lane.b32.xlu1 %v1216_v58, %s2515_s29 }
 0x1a0   : > { %608 = vrot.lane.b32.xlu0 %v575_v57, %s2511_s20 }
 0x1a3   : > { %610 = vrot.lane.b32.xlu1 %v583_v62, %s2511_s20 }
 0x1a4   : > { %825 = vrot.lane.b32.xlu0 %v792_v61, %s2513_s22 }
 0x1a7   : > { %827 = vrot.lane.b32.xlu1 %v800_v2, %s2513_s22 }
 0x1a8   : > { %1041 = vrot.lane.b32.xlu0 %v1008_v1, %s2514_s23 }
 0x1ab   : > { %1043 = vrot.lane.b32.xlu1 %v1016_v6, %s2514_s23 }
 0x1ac   : > { %1257 = vrot.lane.b32.xlu0 %v1224_v5, %s2515_s29 }
 0x1af   : > { %1259 = vrot.lane.b32.xlu1 %v1232_v10, %s2515_s29 }
 0x1b0   : > { %612 = vrot.lane.b32.xlu0 %v591_v9, %s2511_s20 }
 0x1b3   : > { %614 = vrot.lane.b32.xlu1 %v599_v14, %s2511_s20 }
 0x1b4   : > { %829 = vrot.lane.b32.xlu0 %v808_v13, %s2513_s22  ;;  %v2895_v13 = vld [vmem:[%s3047_s5] sm:$0xf] }
 0x1b6   : > { %v706_v17 = vpop.permute.xlu0 %705 }
 0x1b7   : > { %729 = vst.msk [vmem:[#allocation3 + $0x4] sm:$0x3] %vm511_vm4, %v706_v17  ;;  %831 = vrot.lane.b32.xlu1 %v816_v19, %s2513_s22  ;;  %s2994_s22 = scalar_lea.hbm %s3049_s7, %s2169_s17 }
 0x1b8   : > { %1045 = vrot.lane.b32.xlu0 %v1024_v18, %s2514_s23 }
 0x1b9   : > { %v708_v26 = vpop.permute.xlu1 %707 }
 0x1ba   : > { %v922_v25 = vpop.permute.xlu0 %921  ;;  %730 = vst.msk [vmem:[#allocation3 + $0x18] sm:$0x3] %vm511_vm4, %v708_v26 }
 0x1bb   : > { %945 = vst.msk [vmem:[#allocation3 + $0x8] sm:$0x3] %vm511_vm4, %v922_v25  ;;  %1047 = vrot.lane.b32.xlu1 %v1032_v29, %s2514_s23  ;;  %s2433_s23 = scalar_lea.vmem %s2996_s18, 1024 }
 0x1bc   : > { %1261 = vrot.lane.b32.xlu0 %v1240_v27, %s2515_s29  ;;  %p2434_p6 = scmp.ne.s32.totalorder %s2996_s18, %s2433_s23 }
 0x1bd   : > { %v924_v32 = vpop.permute.xlu1 %923 }
 0x1be   : > { %v1138_v31 = vpop.permute.xlu0 %1137  ;;  %946 = vst.msk [vmem:[#allocation3 + $0x1c] sm:$0x3] %vm511_vm4, %v924_v32  ;;  %p2435_p12 = pnand %p2434_p6, %p3056_p11 }
 0x1bf   : > { %1161 = vst.msk [vmem:[#allocation3 + $0xc] sm:$0x3] %vm511_vm4, %v1138_v31  ;;  %1263 = vrot.lane.b32.xlu1 %v1248_v33, %s2515_s29  ;;  %s2517_s29 = smov [#allocation7]  }
 0x1c0   : > { %1365 = vrot.lane.b32.xlu0 %v2751_v21, %s2510_s15  ;;  %p2436_p13 = pneg %p2435_p12  ;;  %s2437_s19 = sshll.u32 %s2517_s29, 4  ;;  %s2438_s19 = int_to_ptr.vmem [resolvable:$false] %s2437_s19 }
 0x1c1   : > { %v1140_v36 = vpop.permute.xlu1 %1139  ;;  %s2439_s21 = scalar_lea.vmem %s2438_s19, 2048  ;;  %p2440_p8 = scmp.lt.s32.totalorder %s2996_s18, %s2438_s19 }
 0x1c2   : > { %v1354_v35 = vpop.permute.xlu0 %1353  ;;  %1162 = vst.msk [vmem:[#allocation3 + $0x20] sm:$0x3] %vm511_vm4, %v1140_v36  ;;  %p2441_p10 = scmp.lt.s32.totalorder %s2439_s21, %s2433_s23 }
 0x1c3   : > { %1377 = vst.msk [vmem:[#allocation3 + $0x10] sm:$0x3] %vm511_vm4, %v1354_v35  ;;  %1367 = vrot.lane.b32.xlu1 %v2756_v22, %s2510_s15 }
 0x1c4   : > { %1450 = vperm.xlu0 %2345, %v1442_v34   ;;  %p2442_p0 = por %p2441_p10, %p2440_p8 }
 0x1c5   : > { %v1356_v37 = vpop.permute.xlu1 %1355 }
 0x1c6   : > { %v710_v24 = vpop.permute.xlu0 %709  ;;  %1378 = vst.msk [vmem:[#allocation3 + $0x24] sm:$0x3] %vm511_vm4, %v1356_v37  ;;  %p2443_p2 = pnand %p2442_p0, %p2436_p13 }
 0x1c7   : > { %731 = vst.msk [vmem:[#allocation3 + $0x2c] sm:$0x3] %vm511_vm4, %v710_v24 }
 0x1c9   : > { %v712_v38 = vpop.permute.xlu1 %711 }
 0x1ca   : > { %v926_v21 = vpop.permute.xlu0 %925  ;;  %732 = vst.msk [vmem:[#allocation3 + $0x40] sm:$0x3] %vm511_vm4, %v712_v38  ;;  %v2382_v7 = vld [vmem:[#allocation3 + $0x10] ss:$0 sps:$4 sm:$0xff]  }
 0x1cb   : > { %947 = vst.msk [vmem:[#allocation3 + $0x30] sm:$0x3] %vm511_vm4, %v926_v21  ;;  %v1474_v11 = vsel %vm1472_vm6, %v2382_v7, 0 }
 0x1cd   : > { %v928_v40 = vpop.permute.xlu1 %927  ;;  %v2384_v12 = vld [vmem:[#allocation3 + $0x24] ss:$0 sps:$4 sm:$0xff]  }
 0x1ce   : > { %v1142_v39 = vpop.permute.xlu0 %1141  ;;  %948 = vst.msk [vmem:[#allocation3 + $0x44] sm:$0x3] %vm511_vm4, %v928_v40  ;;  %v1540_v17 = vsel %vm1472_vm6, %v2384_v12, 0 }
 0x1cf   : > { %1163 = vst.msk [vmem:[#allocation3 + $0x34] sm:$0x3] %vm511_vm4, %v1142_v39 }
 0x1d1   : > { %v1144_v22 = vpop.permute.xlu1 %1143 }
 0x1d2   : > { %v1358_v41 = vpop.permute.xlu0 %1357  ;;  %1164 = vst.msk [vmem:[#allocation3 + $0x48] sm:$0x3] %vm511_vm4, %v1144_v22 }
 0x1d3   : > { %1379 = vst.msk [vmem:[#allocation3 + $0x38] sm:$0x3] %vm511_vm4, %v1358_v41 }
 0x1d5   : > { %v1360_v43 = vpop.permute.xlu1 %1359 }
 0x1d6   : > { %v714_v42 = vpop.permute.xlu0 %713  ;;  %1380 = vst.msk [vmem:[#allocation3 + $0x4c] sm:$0x3] %vm511_vm4, %v1360_v43 }
 0x1d7   : > { %733 = vst.msk [vmem:[#allocation3 + $0x54] sm:$0x3] %vm511_vm4, %v714_v42 }
 0x1d9   : > { %v716_v45 = vpop.permute.xlu1 %715 }
 0x1da   : > { %v930_v44 = vpop.permute.xlu0 %929  ;;  %734 = vst.msk [vmem:[#allocation3 + $0x68] sm:$0x3] %vm511_vm4, %v716_v45  ;;  %v2388_v27 = vld [vmem:[#allocation3 + $0x38] ss:$0 sps:$4 sm:$0xff]  }
 0x1db   : > { %949 = vst.msk [vmem:[#allocation3 + $0x58] sm:$0x3] %vm511_vm4, %v930_v44  ;;  %v1606_v32 = vsel %vm1472_vm6, %v2388_v27, 0 }
 0x1dd   : > { %v932_v47 = vpop.permute.xlu1 %931  ;;  %v2390_v33 = vld [vmem:[#allocation3 + $0x4c] ss:$0 sps:$4 sm:$0xff]  }
 0x1de   : > { %v1146_v46 = vpop.permute.xlu0 %1145  ;;  %950 = vst.msk [vmem:[#allocation3 + $0x6c] sm:$0x3] %vm511_vm4, %v932_v47  ;;  %v1672_v24 = vsel %vm1472_vm6, %v2390_v33, 0 }
 0x1df   : > { %1165 = vst.msk [vmem:[#allocation3 + $0x5c] sm:$0x3] %vm511_vm4, %v1146_v46 }
 0x1e1   : > { %v1148_v49 = vpop.permute.xlu1 %1147 }
 0x1e2   : > { %v1362_v48 = vpop.permute.xlu0 %1361  ;;  %1166 = vst.msk [vmem:[#allocation3 + $0x70] sm:$0x3] %vm511_vm4, %v1148_v49 }
 0x1e3   : > { %1381 = vst.msk [vmem:[#allocation3 + $0x60] sm:$0x3] %vm511_vm4, %v1362_v48 }
 0x1e5   : > { %v1364_v51 = vpop.permute.xlu1 %1363 }
 0x1e6   : > { %v718_v50 = vpop.permute.xlu0 %717  ;;  %1382 = vst.msk [vmem:[#allocation3 + $0x74] sm:$0x3] %vm511_vm4, %v1364_v51 }
 0x1e7   : > { %735 = vst.msk [vmem:[#allocation3 + $0x7c] sm:$0x3] %vm511_vm4, %v718_v50 }
 0x1e9   : > { %v720_v53 = vpop.permute.xlu1 %719 }
 0x1ea   : > { %v934_v52 = vpop.permute.xlu0 %933  ;;  %736 = vst.msk [vmem:[#allocation3 + $0x90] sm:$0x3] %vm511_vm4, %v720_v53  ;;  %v2394_v22 = vld [vmem:[#allocation3 + $0x60] ss:$0 sps:$4 sm:$0xff]  }
 0x1eb   : > { %951 = vst.msk [vmem:[#allocation3 + $0x80] sm:$0x3] %vm511_vm4, %v934_v52  ;;  %v1738_v45 = vsel %vm1472_vm6, %v2394_v22, 0 }
 0x1ed   : > { %v936_v55 = vpop.permute.xlu1 %935  ;;  %v2396_v46 = vld [vmem:[#allocation3 + $0x74] ss:$0 sps:$4 sm:$0xff]  }
 0x1ee   : > { %v1150_v54 = vpop.permute.xlu0 %1149  ;;  %952 = vst.msk [vmem:[#allocation3 + $0x94] sm:$0x3] %vm511_vm4, %v936_v55  ;;  %v1804_v50 = vsel %vm1472_vm6, %v2396_v46, 0 }
 0x1ef   : > { %1167 = vst.msk [vmem:[#allocation3 + $0x84] sm:$0x3] %vm511_vm4, %v1150_v54 }
 0x1f1   : > { %v1152_v57 = vpop.permute.xlu1 %1151 }
 0x1f2   : > { %v601_v56 = vpop.permute.xlu0 %600  ;;  %1168 = vst.msk [vmem:[#allocation3 + $0x98] sm:$0x3] %vm511_vm4, %v1152_v57 }
 0x1f3   : > { %625 = vst.msk [vmem:[#allocation3] sm:$0xc] %vm624_vm2, %v601_v56 }
 0x1f5   : > { %v603_v59 = vpop.permute.xlu1 %602 }
 0x1f6   : > { %v818_v58 = vpop.permute.xlu0 %817  ;;  %626 = vst.msk [vmem:[#allocation3 + $0x14] sm:$0xc] %vm624_vm2, %v603_v59 }
 0x1f7   : > { %841 = vst.msk [vmem:[#allocation3 + $0x4] sm:$0xc] %vm624_vm2, %v818_v58 }
 0x1f9   : > { %v820_v61 = vpop.permute.xlu1 %819 }
 0x1fa   : > { %v1034_v60 = vpop.permute.xlu0 %1033  ;;  %842 = vst.msk [vmem:[#allocation3 + $0x18] sm:$0xc] %vm624_vm2, %v820_v61 }
 0x1fb   : > { %1057 = vst.msk [vmem:[#allocation3 + $0x8] sm:$0xc] %vm624_vm2, %v1034_v60 }
 0x1fd   : > { %v1036_v63 = vpop.permute.xlu1 %1035 }
 0x1fe   : > { %v1250_v62 = vpop.permute.xlu0 %1249  ;;  %v2379_v0 = vld [vmem:[#allocation3] sm:$0xff]   ;;  %1058 = vst.msk [vmem:[#allocation3 + $0x1c] sm:$0xc] %vm624_vm2, %v1036_v63 }
 0x1ff   : > { %1273 = vst.msk [vmem:[#allocation3 + $0xc] sm:$0xc] %vm624_vm2, %v1250_v62  ;;  %2203 = vmatpush3.bf16.msra.mxu0 %v2379_v0 }
 0x200   : > { %2204 = vmatprep.subr.bf16.mxu0 %v2512_v28 }
 0x201   : > { %v1252_v2 = vpop.permute.xlu1 %1251  ;;  %v2380_v3 = vld [vmem:[#allocation3 + $0x14] sm:$0xff]  }
 0x202   : > { %v605_v1 = vpop.permute.xlu0 %604  ;;  %1274 = vst.msk [vmem:[#allocation3 + $0x20] sm:$0xc] %vm624_vm2, %v1252_v2  ;;  %2213 = vmatpush3.bf16.msra.mxu1 %v2380_v3 }
 0x203   : > { %627 = vst.msk [vmem:[#allocation3 + $0x28] sm:$0xc] %vm624_vm2, %v605_v1  ;;  %2214 = vmatprep.subr.bf16.mxu1 %v2512_v28 }
 0x205   : > { %v607_v5 = vpop.permute.xlu1 %606 }
 0x206   : > { %v822_v4 = vpop.permute.xlu0 %821  ;;  %v2381_v6 = vld [vmem:[#allocation3 + $0x8] sm:$0xff]   ;;  %628 = vst.msk [vmem:[#allocation3 + $0x3c] sm:$0xc] %vm624_vm2, %v607_v5 }
 0x207   : > { %843 = vst.msk [vmem:[#allocation3 + $0x2c] sm:$0xc] %vm624_vm2, %v822_v4  ;;  %2205 = vmatpush3.bf16.msra.mxu0 %v2381_v6 }
 0x208   : > { %2206 = vmatprep.subr.bf16.mxu0 %v2512_v28 }
 0x209   : > { %v824_v9 = vpop.permute.xlu1 %823  ;;  %v2383_v10 = vld [vmem:[#allocation3 + $0x1c] sm:$0xff]  }
 0x20a   : > { %v1038_v8 = vpop.permute.xlu0 %1037  ;;  %844 = vst.msk [vmem:[#allocation3 + $0x40] sm:$0xc] %vm624_vm2, %v824_v9  ;;  %2215 = vmatpush3.bf16.msra.mxu1 %v2383_v10 }
 0x20b   : > { %1059 = vst.msk [vmem:[#allocation3 + $0x30] sm:$0xc] %vm624_vm2, %v1038_v8  ;;  %2207 = vmatpush3.bf16.msra.mxu0 %v1474_v11  ;;  %2216 = vmatprep.subr.bf16.mxu1 %v2512_v28 }
 0x20c   : > { %2222 = vmatprep.subr.bf16.mxu0 %v2512_v28 }
 0x20d   : > { %v1040_v15 = vpop.permute.xlu1 %1039 }
 0x20e   : > { %v1254_v14 = vpop.permute.xlu0 %1253  ;;  %v2385_v16 = vld [vmem:[#allocation3 + $0x28] sm:$0xff]   ;;  %1060 = vst.msk [vmem:[#allocation3 + $0x44] sm:$0xc] %vm624_vm2, %v1040_v15  ;;  %2209 = vmatmul.mubr.msk.bf16.vlgmr.msra.gmra.mrb[0].mxu0 %vm1468_vm7, %v2895_v13  ;;  %2217 = vmatpush3.bf16.msra.mxu1 %v1540_v17 }
 0x20f   : > { %1275 = vst.msk [vmem:[#allocation3 + $0x34] sm:$0xc] %vm624_vm2, %v1254_v14  ;;  %2223 = vmatpush3.bf16.msra.mxu0 %v2385_v16  ;;  %2232 = vmatprep.subr.bf16.mxu1 %v2512_v28 }
 0x210   : > { %2224 = vmatprep.subr.bf16.mxu0 %v2512_v28  ;;  %2228 = vmatprep.mubr.msk.bf16.mxu0 %vm2516_vm5, %v2512_v28 }
 0x211   : > { %v1256_v19 = vpop.permute.xlu1 %1255  ;;  %v2386_v20 = vld [vmem:[#allocation3 + $0x3c] sm:$0xff]   ;;  %2219 = vmatmul.mubr.msk.bf16.vlgmr.msra.gmra.mrb[0].mxu1 %vm1468_vm7, %v2895_v13 }
 0x212   : > { %v609_v18 = vpop.permute.xlu0 %608  ;;  %1276 = vst.msk [vmem:[#allocation3 + $0x48] sm:$0xc] %vm624_vm2, %v1256_v19  ;;  %2233 = vmatpush3.bf16.msra.mxu1 %v2386_v20  ;;  %2238 = vmatprep.mubr.msk.bf16.mxu1 %vm2516_vm5, %v2512_v28 }
 0x213   : > { %629 = vst.msk [vmem:[#allocation3 + $0x50] sm:$0xc] %vm624_vm2, %v609_v18  ;;  %2234 = vmatprep.subr.bf16.mxu1 %v2512_v28 }
 0x215   : > { %v611_v25 = vpop.permute.xlu1 %610 }
 0x216   : > { %v826_v23 = vpop.permute.xlu0 %825  ;;  %v2387_v26 = vld [vmem:[#allocation3 + $0x30] sm:$0xff]   ;;  %630 = vst.msk [vmem:[#allocation3 + $0x64] sm:$0xc] %vm624_vm2, %v611_v25 }
 0x217   : > { %845 = vst.msk [vmem:[#allocation3 + $0x54] sm:$0xc] %vm624_vm2, %v826_v23  ;;  %2225 = vmatpush3.bf16.msra.mxu0 %v2387_v26 }
 0x218   : > { %2226 = vmatprep.subr.bf16.mxu0 %v2512_v28 }
 0x219   : > { %v828_v30 = vpop.permute.xlu1 %827  ;;  %v2389_v31 = vld [vmem:[#allocation3 + $0x44] sm:$0xff]  }
 0x21a   : > { %v1042_v29 = vpop.permute.xlu0 %1041  ;;  %846 = vst.msk [vmem:[#allocation3 + $0x68] sm:$0xc] %vm624_vm2, %v828_v30  ;;  %2235 = vmatpush3.bf16.msra.mxu1 %v2389_v31 }
 0x21b   : > { %1061 = vst.msk [vmem:[#allocation3 + $0x58] sm:$0xc] %vm624_vm2, %v1042_v29  ;;  %2227 = vmatpush3.bf16.msra.mxu0 %v1606_v32  ;;  %2236 = vmatprep.subr.bf16.mxu1 %v2512_v28 }
 0x21c   : > { %2242 = vmatprep.subr.bf16.mxu0 %v2512_v28 }
 0x21d   : > { %v1044_v35 = vpop.permute.xlu1 %1043 }
 0x21e   : > { %v1258_v34 = vpop.permute.xlu0 %1257  ;;  %v2391_v36 = vld [vmem:[#allocation3 + $0x50] sm:$0xff]   ;;  %1062 = vst.msk [vmem:[#allocation3 + $0x6c] sm:$0xc] %vm624_vm2, %v1044_v35  ;;  %2229 = vmatmul.mubr.msk.bf16.vlgmr.msra.gmra.mrb[4].mxu0 %vm1468_vm7, %v2895_v13  ;;  %2237 = vmatpush3.bf16.msra.mxu1 %v1672_v24 }
 0x21f   : > { %1277 = vst.msk [vmem:[#allocation3 + $0x5c] sm:$0xc] %vm624_vm2, %v1258_v34  ;;  %2243 = vmatpush3.bf16.msra.mxu0 %v2391_v36  ;;  %2252 = vmatprep.subr.bf16.mxu1 %v2512_v28 }
 0x220   : > { %2244 = vmatprep.subr.bf16.mxu0 %v2512_v28  ;;  %2248 = vmatprep.mubr.msk.bf16.mxu0 %vm2516_vm5, %v2512_v28 }
 0x221   : > { %v1260_v21 = vpop.permute.xlu1 %1259  ;;  %v2392_v38 = vld [vmem:[#allocation3 + $0x64] sm:$0xff]   ;;  %2239 = vmatmul.mubr.msk.bf16.vlgmr.msra.gmra.mrb[4].mxu1 %vm1468_vm7, %v2895_v13 }
 0x222   : > { %v613_v37 = vpop.permute.xlu0 %612  ;;  %1278 = vst.msk [vmem:[#allocation3 + $0x70] sm:$0xc] %vm624_vm2, %v1260_v21  ;;  %2253 = vmatpush3.bf16.msra.mxu1 %v2392_v38  ;;  %2258 = vmatprep.mubr.msk.bf16.mxu1 %vm2516_vm5, %v2512_v28 }
 0x223   : > { %631 = vst.msk [vmem:[#allocation3 + $0x78] sm:$0xc] %vm624_vm2, %v613_v37  ;;  %2254 = vmatprep.subr.bf16.mxu1 %v2512_v28 }
 0x225   : > { %v615_v40 = vpop.permute.xlu1 %614 }
 0x226   : > { %v830_v39 = vpop.permute.xlu0 %829  ;;  %v2393_v41 = vld [vmem:[#allocation3 + $0x58] sm:$0xff]   ;;  %632 = vst.msk [vmem:[#allocation3 + $0x8c] sm:$0xc] %vm624_vm2, %v615_v40 }
 0x227   : > { %847 = vst.msk [vmem:[#allocation3 + $0x7c] sm:$0xc] %vm624_vm2, %v830_v39  ;;  %2245 = vmatpush3.bf16.msra.mxu0 %v2393_v41 }
 0x228   : > { %2246 = vmatprep.subr.bf16.mxu0 %v2512_v28 }
 0x229   : > { %v832_v43 = vpop.permute.xlu1 %831  ;;  %v2395_v44 = vld [vmem:[#allocation3 + $0x6c] sm:$0xff]  }
 0x22a   : > { %v1046_v42 = vpop.permute.xlu0 %1045  ;;  %848 = vst.msk [vmem:[#allocation3 + $0x90] sm:$0xc] %vm624_vm2, %v832_v43  ;;  %2255 = vmatpush3.bf16.msra.mxu1 %v2395_v44 }
 0x22b   : > { %1063 = vst.msk [vmem:[#allocation3 + $0x80] sm:$0xc] %vm624_vm2, %v1046_v42  ;;  %2247 = vmatpush3.bf16.msra.mxu0 %v1738_v45  ;;  %2256 = vmatprep.subr.bf16.mxu1 %v2512_v28 }
 0x22c   : > { %2262 = vmatprep.subr.bf16.mxu0 %v2512_v28 }
 0x22d   : > { %v1048_v48 = vpop.permute.xlu1 %1047 }
 0x22e   : > { %v1262_v47 = vpop.permute.xlu0 %1261  ;;  %v2397_v49 = vld [vmem:[#allocation3 + $0x78] sm:$0xff]   ;;  %1064 = vst.msk [vmem:[#allocation3 + $0x94] sm:$0xc] %vm624_vm2, %v1048_v48  ;;  %2249 = vmatmul.mubr.msk.bf16.vlgmr.msra.gmra.mrb[8].mxu0 %vm1468_vm7, %v2895_v13  ;;  %2257 = vmatpush3.bf16.msra.mxu1 %v1804_v50 }
 0x22f   : > { %1279 = vst.msk [vmem:[#allocation3 + $0x84] sm:$0xc] %vm624_vm2, %v1262_v47  ;;  %2263 = vmatpush3.bf16.msra.mxu0 %v2397_v49  ;;  %2272 = vmatprep.subr.bf16.mxu1 %v2512_v28 }
 0x230   : > { %2264 = vmatprep.subr.bf16.mxu0 %v2512_v28  ;;  %2268 = vmatprep.mubr.msk.bf16.mxu0 %vm2516_vm5, %v2512_v28 }
 0x231   : > { %v1264_v52 = vpop.permute.xlu1 %1263  ;;  %v2398_v53 = vld [vmem:[#allocation3 + $0x8c] sm:$0xff]   ;;  %2259 = vmatmul.mubr.msk.bf16.vlgmr.msra.gmra.mrb[8].mxu1 %vm1468_vm7, %v2895_v13 }
 0x232   : > { %v1366_v51 = vpop.permute.xlu0 %1365  ;;  %1280 = vst.msk [vmem:[#allocation3 + $0x98] sm:$0xc] %vm624_vm2, %v1264_v52  ;;  %2273 = vmatpush3.bf16.msra.mxu1 %v2398_v53  ;;  %2278 = vmatprep.mubr.msk.bf16.mxu1 %vm2516_vm5, %v2512_v28 }
 0x233   : > { %1383 = vst.msk [vmem:[#allocation3 + $0x88] sm:$0x3] %vm511_vm4, %v1366_v51  ;;  %2274 = vmatprep.subr.bf16.mxu1 %v2512_v28 }
 0x235   : > { %v1368_v54 = vpop.permute.xlu1 %1367 }
 0x236   : > { %v2399_v55 = vld [vmem:[#allocation3 + $0x80] sm:$0xff]   ;;  %1384 = vst.msk [vmem:[#allocation3 + $0x9c] sm:$0x3] %vm511_vm4, %v1368_v54 }
 0x237   : > { %2265 = vmatpush3.bf16.msra.mxu0 %v2399_v55 }
 0x238   : > { %2266 = vmatprep.subr.bf16.mxu0 %v2512_v28 }
 0x239   : > { %v2400_v56 = vld [vmem:[#allocation3 + $0x94] sm:$0xff]  }
 0x23a   : > { %v2401_v57 = vld [vmem:[#allocation3 + $0x88] ss:$0 sps:$4 sm:$0xff]   ;;  %2275 = vmatpush3.bf16.msra.mxu1 %v2400_v56 }
 0x23b   : > { %v1870_v58 = vsel %vm1472_vm6, %v2401_v57, 0  ;;  %2276 = vmatprep.subr.bf16.mxu1 %v2512_v28 }
 0x23c   : > { %2267 = vmatpush3.bf16.msra.mxu0 %v1870_v58 }
 0x23d   : > { %v2402_v59 = vld [vmem:[#allocation3 + $0x9c] ss:$0 sps:$4 sm:$0xff]  }
 0x23e   : > { %v1936_v60 = vsel %vm1472_vm6, %v2402_v59, 0 }
 0x23f   : > { %2269 = vmatmul.mubr.msk.bf16.vlgmr.msra.gmra.mrb[12].mxu0 %vm1468_vm7, %v2895_v13  ;;  %2277 = vmatpush3.bf16.msra.mxu1 %v1936_v60 }
 0x242   : > { %2279 = vmatmul.mubr.msk.bf16.vlgmr.msra.gmra.mrb[12].mxu1 %vm1468_vm7, %v2895_v13 }
 0x243   : > { %v1451_v61 = vpop.permute.xlu0 %1450 }
 0x2e1   : > { %v1510_v62 = vpop.f32.mrb[0].mxu0 }
 0x2e2   : > { %v1511_v63 = vadd.f32 %v1510_v62, %v1451_v61  ;;  %v2210_v0 = vpop.f32.mrb[1].mxu0 }
 0x2e3   : > { %v1513_v1 = vpop.f32.mrb[2].mxu0 }
 0x2e4   : > { %1517 = vst.msk [vmem:[%s2973_s11] sm:$0xff] %vm1516_vm8, %v1511_v63  ;;  %v2211_v28 = vpop.f32.mrb[3].mxu0  ;;  %v1576_v2 = vpop.f32.mrb[0].mxu1 }
 0x2e5   : > { %v1577_v3 = vadd.f32 %v1576_v2, %v1451_v61  ;;  %v2220_v4 = vpop.f32.mrb[1].mxu1 }
 0x2e6   : > { %v1579_v5 = vpop.f32.mrb[2].mxu1 }
 0x2e7   : > { %2124 = vst.msk [vmem:[%s2973_s11 + $0x8] sm:$0xff] %vm1516_vm8, %v1577_v3  ;;  %v2221_v6 = vpop.f32.mrb[3].mxu1 }
 0x2f1   : > { %v1642_v7 = vpop.f32.mrb[4].mxu0 }
 0x2f2   : > { %v1643_v8 = vadd.f32 %v1642_v7, %v1451_v61  ;;  %v2230_v9 = vpop.f32.mrb[5].mxu0 }
 0x2f3   : > { %v1645_v10 = vpop.f32.mrb[6].mxu0 }
 0x2f4   : > { %2129 = vst.msk [vmem:[%s2973_s11 + $0x10] sm:$0xff] %vm1516_vm8, %v1643_v8  ;;  %v2231_v11 = vpop.f32.mrb[7].mxu0  ;;  %v1708_v12 = vpop.f32.mrb[4].mxu1 }
 0x2f5   : > { %v1709_v13 = vadd.f32 %v1708_v12, %v1451_v61  ;;  %v2240_v14 = vpop.f32.mrb[5].mxu1 }
 0x2f6   : > { %v1711_v15 = vpop.f32.mrb[6].mxu1 }
 0x2f7   : > { %2134 = vst.msk [vmem:[%s2973_s11 + $0x18] sm:$0xff] %vm1516_vm8, %v1709_v13  ;;  %v2241_v16 = vpop.f32.mrb[7].mxu1 }
 0x301   : > { %v1774_v17 = vpop.f32.mrb[8].mxu0 }
 0x302   : > { %v1775_v18 = vadd.f32 %v1774_v17, %v1451_v61  ;;  %v2250_v19 = vpop.f32.mrb[9].mxu0 }
 0x303   : > { %v1777_v20 = vpop.f32.mrb[10].mxu0 }
 0x304   : > { %2139 = vst.msk [vmem:[%s2973_s11 + $0x20] sm:$0xff] %vm1516_vm8, %v1775_v18  ;;  %v2251_v23 = vpop.f32.mrb[11].mxu0  ;;  %v1840_v25 = vpop.f32.mrb[8].mxu1 }
 0x305   : > { %v1841_v26 = vadd.f32 %v1840_v25, %v1451_v61  ;;  %v2260_v27 = vpop.f32.mrb[9].mxu1 }
 0x306   : > { %v1843_v29 = vpop.f32.mrb[10].mxu1 }
 0x307   : > { %2144 = vst.msk [vmem:[%s2973_s11 + $0x28] sm:$0xff] %vm1516_vm8, %v1841_v26  ;;  %v2261_v30 = vpop.f32.mrb[11].mxu1 }
 0x312   : > { %v1906_v31 = vpop.f32.mrb[12].mxu0 }
 0x313   : > { %v1907_v32 = vadd.f32 %v1906_v31, %v1451_v61  ;;  %v2270_v33 = vpop.f32.mrb[13].mxu0 }
 0x314   : > { %v1909_v34 = vpop.f32.mrb[14].mxu0 }
 0x315   : > { %2149 = vst.msk [vmem:[%s2973_s11 + $0x30] sm:$0xff] %vm1516_vm8, %v1907_v32  ;;  %v2271_v35 = vpop.f32.mrb[15].mxu0  ;;  %v1972_v36 = vpop.f32.mrb[12].mxu1 }
 0x316   : > { %v1973_v24 = vadd.f32 %v1972_v36, %v1451_v61  ;;  %v2280_v37 = vpop.f32.mrb[13].mxu1 }
 0x317   : > { %v1975_v21 = vpop.f32.mrb[14].mxu1 }
 0x318   : > { %2154 = vst.msk [vmem:[%s2973_s11 + $0x38] sm:$0xff] %vm1516_vm8, %v1973_v24  ;;  %v2281_v38 = vpop.f32.mrb[15].mxu1 }
 0x319   : > { %2446 = shalt.err (!%p2443_p2)
}
 0x31a   : > { %s2447_s12 = scalar_lea.hbm %s2994_s22, 1024  ;;  %s2451_s11 = scalar_lea.hbm %s3049_s7, 2048 }
 0x31b   : > { %p2448_p4 = scmp.ne.s32.totalorder %s2994_s22, %s2447_s12  ;;  %p2452_p9 = scmp.lt.u32.totalorder %s2994_s22, %s3049_s7 }
 0x31c   : > { %p2453_p1 = scmp.lt.u32.totalorder %s2451_s11, %s2447_s12  ;;  %p2455_p6 = scmp.lt.u32.totalorder %s2447_s12, %s2994_s22 }
 0x31d   : > { %p2449_p5 = pnand %p2448_p4, %p3056_p11 }
 0x31e   : > { %p2454_p3 = por %p2453_p1, %p2452_p9 }
 0x31f   : > { %p2450_p7 = pneg %p2449_p5 }
 0x320   : > { %p2456_p12 = por %p2455_p6, %p2454_p3 }
 0x322   : > { %p2457_p13 = pnand %p2456_p12, %p2450_p7 }
 0x324   : > { %2460 = shalt.err (!%p2457_p13)
}
 0x325   : > { %s2518_s20 = smov 128   ;;  %s2519_s23 = smov 8  }
 0x326   : > { %2284 = dma.vmem_to_hbm [thread:$0]  (%p3056_p11), %s2996_s18, 1024, %s2994_s22, %s1981_s28, %s2518_s20, %s2518_s20, %s2519_s23  }
 0x327 PF: > { %s2009_s29 = sand.u32 1, %s2487_s24   ;;  %p3057_p8 = scmp.ne.s32.totalorder %s3054_s14, 0 }
 0x328   : > { %p3058_p10 = scmp.ge.s32.totalorder %s2499_s27, 2  ;;  %s2010_s19 = scalar_lea.sflag [#allocation6], %s2009_s29 }
 0x32a   : > { %p2291_p0 = pnand %p3058_p10, %p3057_p8 }
 0x32c   : > { %2482 = dma.done.wait (!%p2291_p0), %s2010_s19, 1024  }
 0x32d   : > { %2484 = vsyncadd (!%p2291_p0), %s2010_s19, 4294966272  ;;  %p20_p2 = scmp.ge.s32.totalorder %s2585_s30, 4   ;;  %s3059_s24 = smov %s2491_s25 }
 0x32e   : > { %s3060_s25 = smov %s2495_s26  ;;  %s3061_s26 = smov %s2597_s10 }
 0x32f   : > { %s3062_s27 = smov %s2585_s30  ;;  %22 = sbr.rel (!%p20_p2) target bundleno = 5 (0x5), region = 107 }
 0x336   :  { %2015 = vsyncpa [#allocation5], 1 }
 0x337   :  { %2017 = vsyncpa [#allocation5 + $0x1], 1 }
 0x338   :  { %2018 = vsyncpa [#allocation6], 1 }
 0x339   :  { %2020 = vsyncpa [#allocation6 + $0x1], 1 }

</bundles_post_ra>
